<compile_context>
chip_gen: v5e
topology: v5e:2x2
jax: 0.10.0
libtpu: 0.0.40
codegen_flags: <defaults>
</compile_context>

<pallas_src>
import math

import jax
import jax.numpy as jnp
from jax.experimental import pallas as pl
from jax.experimental.pallas import tpu as pltpu


def _round_up(x, m):
    return (x + m - 1) // m * m


def _rnn_ae_cell_kernel(x_ref,
                        wh1_ref, bh1_ref,
                        wh2_ref, bh2_ref,
                        wo1_ref, bo1_ref,
                        wo2_ref, bo2_ref,
                        wo3_ref, bo3_ref,
                        out_ref):
    """One fused RNN_ae cell with zero recurrent state:
        out = i2o_layers( i2h(x) )   (recurrent half of the first i2o layer dropped)

    Matmul operands are bf16, accumulation + bias-add are f32, ReLU runs on the
    bf16-cast value (bit-identical to relu-then-cast, cheaper VALU on v6e/v7x).
    """
    f32 = jnp.float32
    bf16 = jnp.bfloat16

    # i2h layer 1: Linear(input, 100) + ReLU
    a = jnp.dot(x_ref[...], wh1_ref[...], preferred_element_type=f32) + bh1_ref[...]
    a = jnp.maximum(a.astype(bf16), 0)

    # i2h layer 2: Linear(100, hidden) + ReLU   -> hidden_new
    h_new = jnp.dot(a, wh2_ref[...], preferred_element_type=f32) + bh2_ref[...]
    h_new = jnp.maximum(h_new.astype(bf16), 0)

    # i2o layer 1: cat([hidden_new, hidden=0], 1) @ W1 + b1
    #   hidden is provably zero, so only the hidden_new half of W1 contributes.
    c = jnp.dot(h_new, wo1_ref[...], preferred_element_type=f32) + bo1_ref[...]
    c = jnp.maximum(c.astype(bf16), 0)

    # i2o layer 2: Linear(500, 200) + ReLU
    d = jnp.dot(c, wo2_ref[...], preferred_element_type=f32) + bo2_ref[...]
    d = jnp.maximum(d.astype(bf16), 0)

    # i2o layer 3: Linear(200, output)
    out = jnp.dot(d, wo3_ref[...], preferred_element_type=f32) + bo3_ref[...]
    out_ref[...] = out.astype(out_ref.dtype)


def init_rnn_ae_params(key, input_size, output_size, hidden_size=500):
    """nn.Linear-style init U(-1/sqrt(fan_in), 1/sqrt(fan_in)); weights stored (fan_in, fan_out)."""
    def linear(k, fan_in, fan_out):
        kw, kb = jax.random.split(k)
        bound = 1.0 / math.sqrt(fan_in)
        w = jax.random.uniform(kw, (fan_in, fan_out), jnp.float32, -bound, bound)
        b = jax.random.uniform(kb, (fan_out,), jnp.float32, -bound, bound)
        return w, b

    keys = jax.random.split(key, 5)
    p = {}
    p["w_h1"], p["b_h1"] = linear(keys[0], input_size, 100)
    p["w_h2"], p["b_h2"] = linear(keys[1], 100, hidden_size)
    p["w_o1"], p["b_o1"] = linear(keys[2], hidden_size * 2, 500)
    p["w_o2"], p["b_o2"] = linear(keys[3], 500, 200)
    p["w_o3"], p["b_o3"] = linear(keys[4], 200, output_size)
    return p


def pad_rnn_ae_params(p, input_size, output_size, hidden_size=500):
    """Zero-pad layer dims to 128 multiples; weights -> bf16, biases stay f32.

    Only the first `hidden_size` rows of w_o1 are kept: they multiply hidden_new.
    The remaining rows multiply the recurrent hidden state, which is always zero
    in this module, so they are dropped (see module-level comment).
    """
    in_p = _round_up(input_size, 128)
    d100p = 128
    hid_p = _round_up(hidden_size, 128)   # 500 -> 512 (also 256-aligned)
    d500p = 512
    d200p = 256
    out_p = _round_up(output_size, 128)

    def padw(w, r, c):
        out = jnp.zeros((r, c), jnp.bfloat16)
        return out.at[:w.shape[0], :w.shape[1]].set(w.astype(jnp.bfloat16))

    def padb(b, c):
        out = jnp.zeros((1, c), jnp.float32)
        return out.at[0, :b.shape[0]].set(b)

    return {
        "w_h1": padw(p["w_h1"], in_p, d100p),  "b_h1": padb(p["b_h1"], d100p),
        "w_h2": padw(p["w_h2"], d100p, hid_p), "b_h2": padb(p["b_h2"], hid_p),
        "w_o1_h": padw(p["w_o1"][:hidden_size], hid_p, d500p),
        "b_o1": padb(p["b_o1"], d500p),
        "w_o2": padw(p["w_o2"], d500p, d200p), "b_o2": padb(p["b_o2"], d200p),
        "w_o3": padw(p["w_o3"], d200p, out_p), "b_o3": padb(p["b_o3"], out_p),
    }


def _choose_block_b(B):
    """Batch-tile policy.

    * B <= 128  : one tile, rounded to 16 (bf16 sublane pack) -- pad waste <= 15 rows.
    * B <= 1024 : 128-row tiles -> grid >= 2 for B > 128 (both v7x TCs busy via
                  'parallel' semantics), pad waste < 128 rows, 128-aligned for v5e MXU.
    * larger    : 256-row tiles (full 256-wide MXU M tile on v6e/v7x, still 128-aligned).
    """
    if B <= 128:
        return _round_up(max(B, 16), 16)
    if B <= 1024:
        return 128
    return 256


def rnn_ae_cell(x_t, pp, output_size):
    """Fused Pallas cell with zero hidden state. x_t: (B, input_size) f32.
    Returns (B, output_size) f32."""
    B, input_size = x_t.shape
    in_p = pp["w_h1"].shape[0]
    out_p = pp["w_o3"].shape[1]

    block_b = _choose_block_b(B)
    b_pad = _round_up(B, block_b)

    # Zero-pad the activation tile (padded rows/lanes stay zero through every layer
    # because the weight/bias pads are zero); extra rows are sliced off at the end.
    x_p = jnp.zeros((b_pad, in_p), jnp.bfloat16).at[:B, :input_size].set(
        x_t.astype(jnp.bfloat16))

    def full(arr):  # whole (small) parameter resident in VMEM every grid step
        return pl.BlockSpec(arr.shape, lambda i: (0, 0))

    out = pl.pallas_call(
        _rnn_ae_cell_kernel,
        out_shape=jax.ShapeDtypeStruct((b_pad, out_p), jnp.float32),
        grid_spec=pltpu.PrefetchScalarGridSpec(
            num_scalar_prefetch=0,
            grid=(b_pad // block_b,),
            in_specs=[
                pl.BlockSpec((block_b, in_p), lambda i: (i, 0)),   # x tile
                full(pp["w_h1"]), full(pp["b_h1"]),
                full(pp["w_h2"]), full(pp["b_h2"]),
                full(pp["w_o1_h"]), full(pp["b_o1"]),
                full(pp["w_o2"]), full(pp["b_o2"]),
                full(pp["w_o3"]), full(pp["b_o3"]),
            ],
            out_specs=pl.BlockSpec((block_b, out_p), lambda i: (i, 0)),
        ),
        compiler_params=pltpu.CompilerParams(
            dimension_semantics=("parallel",),
        ),
    )(x_p,
      pp["w_h1"], pp["b_h1"],
      pp["w_h2"], pp["b_h2"],
      pp["w_o1_h"], pp["b_o1"],
      pp["w_o2"], pp["b_o2"],
      pp["w_o3"], pp["b_o3"])

    return out[:B, :output_size]


def rnn_ae_forward(inputs, pp, output_size, hidden_size=500):
    """RNN_ae.forward.

    _forward returns the *incoming* hidden (never hidden_new), so the recurrent
    state stays at its zero init and the loop's final output depends only on the
    last timestep: a single fused cell with an implicit zero hidden reproduces
    the loop exactly.  If the upstream module is ever changed to carry hidden_new
    forward, this shortcut (and the dropped recurrent weight half) is invalid.
    """
    n = inputs.shape[0]
    del hidden_size  # hidden state is structurally zero; never materialized
    return rnn_ae_cell(inputs[n - 1], pp, output_size)


def rnn_ae_reference(inputs, p, hidden_size=500):
    """Pure-JAX f32 reference that literally replays the PyTorch per-step loop
    (including the concat against the zero hidden state and the full w_o1)."""
    n, c, _ = inputs.shape
    hid = jnp.zeros((c, hidden_size), jnp.float32)
    out = None
    for i in range(n):
        h1 = jnp.maximum(inputs[i] @ p["w_h1"] + p["b_h1"], 0.0)
        h_new = jnp.maximum(h1 @ p["w_h2"] + p["b_h2"], 0.0)
        combined = jnp.concatenate([h_new, hid], axis=1)
        x = jnp.maximum(combined @ p["w_o1"] + p["b_o1"], 0.0)
        x = jnp.maximum(x @ p["w_o2"] + p["b_o2"], 0.0)
        out = x @ p["w_o3"] + p["b_o3"]
        # hid intentionally NOT updated (matches _forward returning `hidden`)
    return out


if __name__ == "__main__":
    key = jax.random.PRNGKey(0)
    k_param, k_x = jax.random.split(key)

    seq_len = 6
    batch = 4
    input_size = 64
    output_size = 32
    hidden_size = 500   # module default; i2o interior widths (500/200) fixed by the spec

    params = init_rnn_ae_params(k_param, input_size, output_size, hidden_size)
    padded = pad_rnn_ae_params(params, input_size, output_size, hidden_size)

    inputs = jax.random.normal(k_x, (seq_len, batch, input_size), jnp.float32)

    out = rnn_ae_forward(inputs, padded, output_size, hidden_size)
    out = jax.block_until_ready(out)

    ref = rnn_ae_reference(inputs, params, hidden_size)
    assert out.shape == (batch, output_size)
    assert jnp.allclose(out, ref, atol=2e-2, rtol=2e-2), (
        f"mismatch vs reference: max abs diff {jnp.max(jnp.abs(out - ref))}")

    print("KERNEL_OK")
</pallas_src>

<mosaic_0001>
module attributes {stable_mosaic.version = 11 : i64} {
  func.func @_rnn_ae_cell_kernel(%arg0: i32, %arg1: memref<16x128xbf16, #tpu.memory_space<vmem>>, %arg2: memref<128x128xbf16, #tpu.memory_space<vmem>>, %arg3: memref<1x128xf32, #tpu.memory_space<vmem>>, %arg4: memref<128x512xbf16, #tpu.memory_space<vmem>>, %arg5: memref<1x512xf32, #tpu.memory_space<vmem>>, %arg6: memref<512x512xbf16, #tpu.memory_space<vmem>>, %arg7: memref<1x512xf32, #tpu.memory_space<vmem>>, %arg8: memref<512x256xbf16, #tpu.memory_space<vmem>>, %arg9: memref<1x256xf32, #tpu.memory_space<vmem>>, %arg10: memref<256x128xbf16, #tpu.memory_space<vmem>>, %arg11: memref<1x128xf32, #tpu.memory_space<vmem>>, %arg12: memref<16x128xf32, #tpu.memory_space<vmem>>) attributes {dimension_semantics = [#tpu.dimension_semantics<parallel>], iteration_bounds = array<i64: 1>, scalar_prefetch = 0 : i64, scratch_operands = 0 : i64, tpu.core_type = #tpu.core_type<tc>, window_params = [{transform_indices = @transform_0, window_bounds = array<i64: 16, 128>}, {pipeline_mode = #tpu.pipeline_mode<synchronous>, transform_indices = @transform_1, window_bounds = array<i64: 128, 128>}, {pipeline_mode = #tpu.pipeline_mode<synchronous>, transform_indices = @transform_2, window_bounds = array<i64: 1, 128>}, {pipeline_mode = #tpu.pipeline_mode<synchronous>, transform_indices = @transform_3, window_bounds = array<i64: 128, 512>}, {pipeline_mode = #tpu.pipeline_mode<synchronous>, transform_indices = @transform_4, window_bounds = array<i64: 1, 512>}, {pipeline_mode = #tpu.pipeline_mode<synchronous>, transform_indices = @transform_5, window_bounds = array<i64: 512, 512>}, {pipeline_mode = #tpu.pipeline_mode<synchronous>, transform_indices = @transform_6, window_bounds = array<i64: 1, 512>}, {pipeline_mode = #tpu.pipeline_mode<synchronous>, transform_indices = @transform_7, window_bounds = array<i64: 512, 256>}, {pipeline_mode = #tpu.pipeline_mode<synchronous>, transform_indices = @transform_8, window_bounds = array<i64: 1, 256>}, {pipeline_mode = #tpu.pipeline_mode<synchronous>, transform_indices = @transform_9, window_bounds = array<i64: 256, 128>}, {pipeline_mode = #tpu.pipeline_mode<synchronous>, transform_indices = @transform_10, window_bounds = array<i64: 1, 128>}, {transform_indices = @transform_11, window_bounds = array<i64: 16, 128>}]} {
    %c0 = arith.constant 0 : index
    %c0_0 = arith.constant 0 : index
    %0 = vector.load %arg1[%c0, %c0_0] : memref<16x128xbf16, #tpu.memory_space<vmem>>, vector<16x128xbf16>
    %c0_1 = arith.constant 0 : index
    %c0_2 = arith.constant 0 : index
    %1 = vector.load %arg2[%c0_1, %c0_2] : memref<128x128xbf16, #tpu.memory_space<vmem>>, vector<128x128xbf16>
    %cst = arith.constant dense<0.000000e+00> : vector<16x128xf32>
    %2 = tpu.matmul %0, %1, %cst {dimension_numbers = #tpu.dot_dimension_numbers<[1], [0], [0], [1], [0, 0, 1, 1], [], []>} : vector<16x128xbf16>, vector<128x128xbf16>, vector<16x128xf32> -> vector<16x128xf32>
    %c0_3 = arith.constant 0 : index
    %c0_4 = arith.constant 0 : index
    %3 = vector.load %arg3[%c0_3, %c0_4] : memref<1x128xf32, #tpu.memory_space<vmem>>, vector<1x128xf32>
    %4 = vector.broadcast %3 : vector<1x128xf32> to vector<16x128xf32>
    %5 = arith.addf %2, %4 : vector<16x128xf32>
    %6 = arith.truncf %5 : vector<16x128xf32> to vector<16x128xbf16>
    %cst_5 = arith.constant 0.000000e+00 : bf16
    %7 = vector.broadcast %cst_5 : bf16 to vector<16x128xbf16>
    %8 = arith.maximumf %6, %7 : vector<16x128xbf16>
    %c0_6 = arith.constant 0 : index
    %c0_7 = arith.constant 0 : index
    %9 = vector.load %arg4[%c0_6, %c0_7] : memref<128x512xbf16, #tpu.memory_space<vmem>>, vector<128x512xbf16>
    %cst_8 = arith.constant dense<0.000000e+00> : vector<16x512xf32>
    %10 = tpu.matmul %8, %9, %cst_8 {dimension_numbers = #tpu.dot_dimension_numbers<[1], [0], [0], [1], [0, 0, 1, 1], [], []>} : vector<16x128xbf16>, vector<128x512xbf16>, vector<16x512xf32> -> vector<16x512xf32>
    %c0_9 = arith.constant 0 : index
    %c0_10 = arith.constant 0 : index
    %11 = vector.load %arg5[%c0_9, %c0_10] : memref<1x512xf32, #tpu.memory_space<vmem>>, vector<1x512xf32>
    %12 = vector.broadcast %11 : vector<1x512xf32> to vector<16x512xf32>
    %13 = arith.addf %10, %12 : vector<16x512xf32>
    %14 = arith.truncf %13 : vector<16x512xf32> to vector<16x512xbf16>
    %cst_11 = arith.constant 0.000000e+00 : bf16
    %15 = vector.broadcast %cst_11 : bf16 to vector<16x512xbf16>
    %16 = arith.maximumf %14, %15 : vector<16x512xbf16>
    %c0_12 = arith.constant 0 : index
    %c0_13 = arith.constant 0 : index
    %17 = vector.load %arg6[%c0_12, %c0_13] : memref<512x512xbf16, #tpu.memory_space<vmem>>, vector<512x512xbf16>
    %cst_14 = arith.constant dense<0.000000e+00> : vector<16x512xf32>
    %18 = tpu.matmul %16, %17, %cst_14 {dimension_numbers = #tpu.dot_dimension_numbers<[1], [0], [0], [1], [0, 0, 1, 1], [], []>} : vector<16x512xbf16>, vector<512x512xbf16>, vector<16x512xf32> -> vector<16x512xf32>
    %c0_15 = arith.constant 0 : index
    %c0_16 = arith.constant 0 : index
    %19 = vector.load %arg7[%c0_15, %c0_16] : memref<1x512xf32, #tpu.memory_space<vmem>>, vector<1x512xf32>
    %20 = vector.broadcast %19 : vector<1x512xf32> to vector<16x512xf32>
    %21 = arith.addf %18, %20 : vector<16x512xf32>
    %22 = arith.truncf %21 : vector<16x512xf32> to vector<16x512xbf16>
    %cst_17 = arith.constant 0.000000e+00 : bf16
    %23 = vector.broadcast %cst_17 : bf16 to vector<16x512xbf16>
    %24 = arith.maximumf %22, %23 : vector<16x512xbf16>
    %c0_18 = arith.constant 0 : index
    %c0_19 = arith.constant 0 : index
    %25 = vector.load %arg8[%c0_18, %c0_19] : memref<512x256xbf16, #tpu.memory_space<vmem>>, vector<512x256xbf16>
    %cst_20 = arith.constant dense<0.000000e+00> : vector<16x256xf32>
    %26 = tpu.matmul %24, %25, %cst_20 {dimension_numbers = #tpu.dot_dimension_numbers<[1], [0], [0], [1], [0, 0, 1, 1], [], []>} : vector<16x512xbf16>, vector<512x256xbf16>, vector<16x256xf32> -> vector<16x256xf32>
    %c0_21 = arith.constant 0 : index
    %c0_22 = arith.constant 0 : index
    %27 = vector.load %arg9[%c0_21, %c0_22] : memref<1x256xf32, #tpu.memory_space<vmem>>, vector<1x256xf32>
    %28 = vector.broadcast %27 : vector<1x256xf32> to vector<16x256xf32>
    %29 = arith.addf %26, %28 : vector<16x256xf32>
    %30 = arith.truncf %29 : vector<16x256xf32> to vector<16x256xbf16>
    %cst_23 = arith.constant 0.000000e+00 : bf16
    %31 = vector.broadcast %cst_23 : bf16 to vector<16x256xbf16>
    %32 = arith.maximumf %30, %31 : vector<16x256xbf16>
    %c0_24 = arith.constant 0 : index
    %c0_25 = arith.constant 0 : index
    %33 = vector.load %arg10[%c0_24, %c0_25] : memref<256x128xbf16, #tpu.memory_space<vmem>>, vector<256x128xbf16>
    %cst_26 = arith.constant dense<0.000000e+00> : vector<16x128xf32>
    %34 = tpu.matmul %32, %33, %cst_26 {dimension_numbers = #tpu.dot_dimension_numbers<[1], [0], [0], [1], [0, 0, 1, 1], [], []>} : vector<16x256xbf16>, vector<256x128xbf16>, vector<16x128xf32> -> vector<16x128xf32>
    %c0_27 = arith.constant 0 : index
    %c0_28 = arith.constant 0 : index
    %35 = vector.load %arg11[%c0_27, %c0_28] : memref<1x128xf32, #tpu.memory_space<vmem>>, vector<1x128xf32>
    %36 = vector.broadcast %35 : vector<1x128xf32> to vector<16x128xf32>
    %37 = arith.addf %34, %36 : vector<16x128xf32>
    %c0_29 = arith.constant 0 : index
    %c0_30 = arith.constant 0 : index
    %38 = vector.load %arg12[%c0_29, %c0_30] : memref<16x128xf32, #tpu.memory_space<vmem>>, vector<16x128xf32>
    tpu.vector_store %arg12[%c0_29, %c0_30], %37 {strides = array<i32>} : memref<16x128xf32, #tpu.memory_space<vmem>>, vector<16x128xf32>,
    return
  }
  func.func @transform_0(%arg0: i32) -> (i32, i32) {
    %c0_i32 = arith.constant 0 : i32
    %c0_i32_0 = arith.constant 0 : i32
    return %arg0, %c0_i32 : i32, i32
  }
  func.func @transform_1(%arg0: i32) -> (i32, i32) {
    %c0_i32 = arith.constant 0 : i32
    %c0_i32_0 = arith.constant 0 : i32
    %c0_i32_1 = arith.constant 0 : i32
    return %c0_i32, %c0_i32_0 : i32, i32
  }
  func.func @transform_2(%arg0: i32) -> (i32, i32) {
    %c0_i32 = arith.constant 0 : i32
    %c0_i32_0 = arith.constant 0 : i32
    %c0_i32_1 = arith.constant 0 : i32
    return %c0_i32, %c0_i32_0 : i32, i32
  }
  func.func @transform_3(%arg0: i32) -> (i32, i32) {
    %c0_i32 = arith.constant 0 : i32
    %c0_i32_0 = arith.constant 0 : i32
    %c0_i32_1 = arith.constant 0 : i32
    return %c0_i32, %c0_i32_0 : i32, i32
  }
  func.func @transform_4(%arg0: i32) -> (i32, i32) {
    %c0_i32 = arith.constant 0 : i32
    %c0_i32_0 = arith.constant 0 : i32
    %c0_i32_1 = arith.constant 0 : i32
    return %c0_i32, %c0_i32_0 : i32, i32
  }
  func.func @transform_5(%arg0: i32) -> (i32, i32) {
    %c0_i32 = arith.constant 0 : i32
    %c0_i32_0 = arith.constant 0 : i32
    %c0_i32_1 = arith.constant 0 : i32
    return %c0_i32, %c0_i32_0 : i32, i32
  }
  func.func @transform_6(%arg0: i32) -> (i32, i32) {
    %c0_i32 = arith.constant 0 : i32
    %c0_i32_0 = arith.constant 0 : i32
    %c0_i32_1 = arith.constant 0 : i32
    return %c0_i32, %c0_i32_0 : i32, i32
  }
  func.func @transform_7(%arg0: i32) -> (i32, i32) {
    %c0_i32 = arith.constant 0 : i32
    %c0_i32_0 = arith.constant 0 : i32
    %c0_i32_1 = arith.constant 0 : i32
    return %c0_i32, %c0_i32_0 : i32, i32
  }
  func.func @transform_8(%arg0: i32) -> (i32, i32) {
    %c0_i32 = arith.constant 0 : i32
    %c0_i32_0 = arith.constant 0 : i32
    %c0_i32_1 = arith.constant 0 : i32
    return %c0_i32, %c0_i32_0 : i32, i32
  }
  func.func @transform_9(%arg0: i32) -> (i32, i32) {
    %c0_i32 = arith.constant 0 : i32
    %c0_i32_0 = arith.constant 0 : i32
    %c0_i32_1 = arith.constant 0 : i32
    return %c0_i32, %c0_i32_0 : i32, i32
  }
  func.func @transform_10(%arg0: i32) -> (i32, i32) {
    %c0_i32 = arith.constant 0 : i32
    %c0_i32_0 = arith.constant 0 : i32
    %c0_i32_1 = arith.constant 0 : i32
    return %c0_i32, %c0_i32_0 : i32, i32
  }
  func.func @transform_11(%arg0: i32) -> (i32, i32) {
    %c0_i32 = arith.constant 0 : i32
    %c0_i32_0 = arith.constant 0 : i32
    return %arg0, %c0_i32 : i32, i32
  }
}

</mosaic_0001>

<bundles_post_ra>
// kernel: tpu_custom_call.1
= control target key start
LH: loop header
LB: loop body
LE: loop exit
PB: predicated region body
PF: predicated region fallthrough
CT: control target
= control target key end

     0   :  { %16 = vsyncpa [#allocation3], 0  ;;  %s3913_s0 = inlined_call_operand.hbm [shape: bf16[16,128], index: 0, kind: input, shape index: {}]   ;;  %s3914_s1 = inlined_call_operand.hbm [shape: bf16[128,128], index: 1, kind: input, shape index: {}]   ;;  %s3915_s2 = inlined_call_operand.hbm [shape: f32[1,128], index: 2, kind: input, shape index: {}]   ;;  %s3916_s3 = inlined_call_operand.hbm [shape: bf16[128,512], index: 3, kind: input, shape index: {}]   ;;  %s3917_s4 = inlined_call_operand.hbm [shape: f32[1,512], index: 4, kind: input, shape index: {}]   ;;  %s3918_s5 = inlined_call_operand.hbm [shape: bf16[512,512], index: 5, kind: input, shape index: {}]   ;;  %s3919_s6 = inlined_call_operand.vmem [shape: f32[1,512], index: 6, kind: input, shape index: {}]   ;;  %s3920_s7 = inlined_call_operand.hbm [shape: bf16[512,256], index: 7, kind: input, shape index: {}]   ;;  %s3921_s8 = inlined_call_operand.vmem [shape: f32[1,256], index: 8, kind: input, shape index: {}]   ;;  %s3922_s9 = inlined_call_operand.hbm [shape: bf16[256,128], index: 9, kind: input, shape index: {}]   ;;  %s3923_s10 = inlined_call_operand.vmem [shape: f32[1,128], index: 10, kind: input, shape index: {}]   ;;  %s3924_s11 = inlined_call_operand.hbm [shape: f32[16,128], index: 11, kind: output, shape index: {}]  }
   0x1   :  { %17 = vsyncpa [#allocation6], 0 }
   0x2   :  { %18 = vsyncpa [#allocation9], 0 }
   0x3   :  { %19 = vsyncpa [#allocation12], 0 }
   0x4   :  { %20 = vsyncpa [#allocation15], 0 }
   0x5   :  { %21 = vsyncpa [#allocation4], 0  ;;  %s39_s19 = sshll.u32 %s3914_s1, 4  ;;  %s3754_s20 = smov [#allocation5]   ;;  %s40_s19 = int_to_ptr.hbm [resolvable:$true] %s39_s19 }
   0x6   :  { %s41_s21 = sshll.u32 %s3754_s20, 4  ;;  %s63_s24 = sshll.u32 %s3916_s3, 4  ;;  %s42_s21 = int_to_ptr.vmem [resolvable:$true] %s41_s21  ;;  %s64_s24 = int_to_ptr.hbm [resolvable:$true] %s63_s24 }
   0x7   :  { %s3755_s25 = smov 64   ;;  %s3756_s26 = smov 4  }
   0x8   :  { %47 = dma.hbm_to_vmem [thread:$0]  %s40_s19, 1024, %s42_s21, [#allocation6], %s3755_s25, %s3755_s25, %s3756_s26  }
   0x9   :  { %s3757_s27 = smov [#allocation8]   ;;  %s3758_s29 = smov 256  }
   0xa   :  { %s65_s28 = sshll.u32 %s3757_s27, 4  ;;  %s3759_s1 = smov 16   ;;  %s66_s28 = int_to_ptr.vmem [resolvable:$true] %s65_s28 }
   0xb   :  { %71 = dma.hbm_to_vmem [thread:$0]  %s64_s24, 4096, %s66_s28, [#allocation9], %s3758_s29, %s3758_s29, %s3759_s1  }
   0xc   :  { %s87_s13 = sshll.u32 %s3918_s5, 4  ;;  %s3760_s14 = smov [#allocation11]   ;;  %s88_s13 = int_to_ptr.hbm [resolvable:$true] %s87_s13 }
   0xd   :  { %s89_s3 = sshll.u32 %s3760_s14, 4  ;;  %s26_s17 = sshll.u32 %s3913_s0, 4  ;;  %s90_s3 = int_to_ptr.vmem [resolvable:$true] %s89_s3  ;;  %s27_s17 = int_to_ptr.hbm [resolvable:$true] %s26_s17 }
   0xe   :  { %95 = dma.hbm_to_vmem [thread:$0]  %s88_s13, 16384, %s90_s3, [#allocation12], %s3758_s29, %s3758_s29, %s3759_s1  }
   0xf   :  { %s3761_s18 = smov [#allocation2]   ;;  %s53_s22 = sshll.u32 %s3915_s2, 4  ;;  %s54_s22 = int_to_ptr.hbm [resolvable:$true] %s53_s22 }
  0x10   :  { %s28_s19 = sshll.u32 %s3761_s18, 4  ;;  %s77_s24 = sshll.u32 %s3917_s4, 4  ;;  %s29_s19 = int_to_ptr.vmem [resolvable:$true] %s28_s19  ;;  %s78_s24 = int_to_ptr.hbm [resolvable:$true] %s77_s24 }
  0x11   :  { %34 = dma.hbm_to_vmem [thread:$0]  %s27_s17, 128, %s29_s19, [#allocation3], %s3755_s25, %s3755_s25, %s3756_s26  }
  0x12   :  { %s3762_s27 = smov [#allocation7]   ;;  %s3763_s28 = smov [#allocation10]  }
  0x13   :  { %s55_s0 = sshll.u32 %s3762_s27, 4  ;;  %s79_s29 = sshll.u32 %s3763_s28, 4  ;;  %s56_s0 = int_to_ptr.vmem [resolvable:$true] %s55_s0  ;;  %s80_s29 = int_to_ptr.vmem [resolvable:$true] %s79_s29 }
  0x14   :  { %58 = dma.hbm_to_vmem [thread:$0]  %s54_s22, 16, %s56_s0, [#allocation6]  }
  0x15   :  { %s102_s2 = sshll.u32 %s3920_s7, 4  ;;  %s3764_s12 = smov [#allocation13]   ;;  %s103_s2 = int_to_ptr.hbm [resolvable:$true] %s102_s2 }
  0x16   :  { %82 = dma.hbm_to_vmem [thread:$0]  %s78_s24, 64, %s80_s29, [#allocation9]  }
  0x17   :  { %s104_s13 = sshll.u32 %s3764_s12, 4  ;;  %s117_s4 = sshll.u32 %s3922_s9, 4  ;;  %s105_s13 = int_to_ptr.vmem [resolvable:$true] %s104_s13  ;;  %s118_s4 = int_to_ptr.hbm [resolvable:$true] %s117_s4 }
  0x18   :  { %s3765_s15 = smov 128   ;;  %s3766_s16 = smov 8  }
  0x19   :  { %110 = dma.hbm_to_vmem [thread:$0]  %s103_s2, 8192, %s105_s13, [#allocation12], %s3765_s15, %s3765_s15, %s3766_s16  }
  0x1a   :  { %s3767_s17 = smov [#allocation14]  }
  0x1b   :  { %s119_s18 = sshll.u32 %s3767_s17, 4  ;;  %s120_s18 = int_to_ptr.vmem [resolvable:$true] %s119_s18 }
  0x1c   :  { %125 = dma.hbm_to_vmem [thread:$0]  %s118_s4, 2048, %s120_s18, [#allocation15], %s3755_s25, %s3755_s25, %s3756_s26  }
  0x1d   :  { %3742 = dma.done.wait [#allocation3], 128  }
  0x1e   :  { %3743 = vsyncadd [#allocation3], 4294967168 }
  0x1f   :  { %3744 = dma.done.wait [#allocation6], 1040  }
  0x20   :  { %3745 = vsyncadd [#allocation6], 4294966256 }
  0x21   :  { %3746 = dma.done.wait [#allocation9], 4160  }
  0x22   :  { %3747 = vsyncadd [#allocation9], 4294963136 }
  0x23   :  { %3748 = dma.done.wait [#allocation12], 24576  }
  0x24   :  { %3749 = vsyncadd [#allocation12], 4294942720 }
  0x25   :  { %3750 = dma.done.wait [#allocation15], 2048  }
  0x26   :  { %3751 = vsyncadd [#allocation15], 4294965248  ;;  %v3268_v0 = vld [vmem:[#allocation5 + $0x38] sm:$0xff]  ;;  %v3267_v1 = vld [vmem:[#allocation5 + $0x30] sm:$0xff]  ;;  %s3768_s19 = smov [#allocation16]   ;;  %s2247_s5 = sshll.u32 %s3924_s11, 4  ;;  %s2248_s5 = int_to_ptr.hbm [resolvable:$true] %s2247_s5 }
  0x27   :  { %236 = vmatpush.bf16.msra.mxu0 %v3268_v0  ;;  %v2414_v2 = vld [vmem:[#allocation8 + $0xe0] sm:$0xf]  ;;  %v3299_v3 = vld [vmem:[#allocation8 + $0xec] sm:$0xf0]  ;;  %v3297_v4 = vld [vmem:[#allocation8 + $0xe4] sm:$0xf] }
  0x28   :  { %v2415_v5 = vor.u32 %v3299_v3, %v2414_v2  ;;  %v2416_v6 = vld [vmem:[#allocation8 + $0xf0] sm:$0xf0]  ;;  %v2422_v7 = vld [vmem:[#allocation8 + $0xe8] sm:$0xf]  ;;  %v3300_v8 = vld [vmem:[#allocation8 + $0xf4] sm:$0xf0] }
  0x29   :  { %v3266_v9 = vld [vmem:[#allocation5 + $0x28] sm:$0xff]  ;;  %v2419_v10 = vor.u32 %v3297_v4, %v2416_v6  ;;  %v2423_v11 = vor.u32 %v3300_v8, %v2422_v7  ;;  %v2398_v12 = vld [vmem:[#allocation8 + $0xc0] sm:$0xf]  ;;  %v3295_v13 = vld [vmem:[#allocation8 + $0xcc] sm:$0xf0]  ;;  %s2245_s20 = sshll.u32 %s3768_s19, 4  ;;  %s2246_s20 = int_to_ptr.vmem [resolvable:$true] %s2245_s20 }
  0x2a   :  { %459 = vmatpush.bf16.msra.mxu1 %v2415_v5  ;;  %v3293_v14 = vld [vmem:[#allocation8 + $0xc4] sm:$0xf]  ;;  %v2400_v15 = vld [vmem:[#allocation8 + $0xd0] sm:$0xf0]  ;;  %v2399_v16 = vor.u32 %v3295_v13, %v2398_v12  ;;  %v2406_v18 = vld [vmem:[#allocation8 + $0xc8] sm:$0xf] }
  0x2b   :  { %237 = vmatpush.bf16.msra.mxu0 %v3267_v1  ;;  %473 = vmatpush.bf16.msra.mxu2 %v2419_v10  ;;  %v2403_v17 = vor.u32 %v3293_v14, %v2400_v15  ;;  %v3296_v19 = vld [vmem:[#allocation8 + $0xd4] sm:$0xf0]  ;;  %v2382_v21 = vld [vmem:[#allocation8 + $0xa0] sm:$0xf]  ;;  %v3291_v22 = vld [vmem:[#allocation8 + $0xac] sm:$0xf0] }
  0x2c   :  { %487 = vmatpush.bf16.msra.mxu3 %v2423_v11  ;;  %v2407_v20 = vor.u32 %v3296_v19, %v2406_v18  ;;  %v3289_v23 = vld [vmem:[#allocation8 + $0xa4] sm:$0xf]  ;;  %v2384_v24 = vld [vmem:[#allocation8 + $0xb0] sm:$0xf0]  ;;  %v2390_v25 = vld [vmem:[#allocation8 + $0xa8] sm:$0xf]  ;;  %v2383_v27 = vor.u32 %v3291_v22, %v2382_v21 }
  0x2d   :  { %v3265_v26 = vld [vmem:[#allocation5 + $0x20] sm:$0xff]  ;;  %v3292_v28 = vld [vmem:[#allocation8 + $0xb4] sm:$0xf0]  ;;  %v2387_v29 = vor.u32 %v3289_v23, %v2384_v24  ;;  %v3287_v32 = vld [vmem:[#allocation8 + $0x8c] sm:$0xf0] }
  0x2e   :  { %460 = vmatpush.bf16.msra.mxu1 %v2399_v16  ;;  %v2391_v30 = vor.u32 %v3292_v28, %v2390_v25  ;;  %v2366_v31 = vld [vmem:[#allocation8 + $0x80] sm:$0xf]  ;;  %v3285_v33 = vld [vmem:[#allocation8 + $0x84] sm:$0xf]  ;;  %v2368_v34 = vld [vmem:[#allocation8 + $0x90] sm:$0xf0] }
  0x2f   :  { %238 = vmatpush.bf16.msra.mxu0 %v3266_v9  ;;  %474 = vmatpush.bf16.msra.mxu2 %v2403_v17  ;;  %v2374_v35 = vld [vmem:[#allocation8 + $0x88] sm:$0xf]  ;;  %v3288_v36 = vld [vmem:[#allocation8 + $0x94] sm:$0xf0]  ;;  %v2367_v38 = vor.u32 %v3287_v32, %v2366_v31  ;;  %v2371_v39 = vor.u32 %v3285_v33, %v2368_v34  ;;  %v3263_v41 = vld [vmem:[#allocation5 + $0x10] sm:$0xff] }
  0x30   :  { %488 = vmatpush.bf16.msra.mxu3 %v2407_v20  ;;  %v3264_v37 = vld [vmem:[#allocation5 + $0x18] sm:$0xff]  ;;  %v2375_v40 = vor.u32 %v3288_v36, %v2374_v35  ;;  %v3262_v42 = vld [vmem:[#allocation5 + $0x8] sm:$0xff]  ;;  %v3261_v45 = vld [vmem:[#allocation5] sm:$0xff] }
  0x31   :  { %v3298_v43 = vld [vmem:[#allocation8 + $0xec] sm:$0xf]  ;;  %v2424_v44 = vld [vmem:[#allocation8 + $0xf8] sm:$0xf0]  ;;  %v2350_v57 = vld [vmem:[#allocation8 + $0x60] sm:$0xf] }
  0x32   :  { %461 = vmatpush.bf16.msra.mxu1 %v2383_v27  ;;  %v2427_v46 = vor.u32 %v3298_v43, %v2424_v44  ;;  %v3294_v47 = vld [vmem:[#allocation8 + $0xcc] sm:$0xf]  ;;  %v2408_v48 = vld [vmem:[#allocation8 + $0xd8] sm:$0xf0]  ;;  %v3283_v58 = vld [vmem:[#allocation8 + $0x6c] sm:$0xf0] }
  0x33   :  { %239 = vmatpush.bf16.msra.mxu0 %v3265_v26  ;;  %475 = vmatpush.bf16.msra.mxu2 %v2387_v29  ;;  %v3260_v49 = vld [vmem:[#allocation2] sm:$0xff]  ;;  %v2411_v50 = vor.u32 %v3294_v47, %v2408_v48  ;;  %v3290_v51 = vld [vmem:[#allocation8 + $0xac] sm:$0xf]  ;;  %v3281_v59 = vld [vmem:[#allocation8 + $0x64] sm:$0xf]  ;;  %v2351_v60 = vor.u32 %v3283_v58, %v2350_v57 }
  0x34   :  { %489 = vmatpush.bf16.msra.mxu3 %v2391_v30  ;;  %v2392_v52 = vld [vmem:[#allocation8 + $0xb8] sm:$0xf0]  ;;  %v3286_v54 = vld [vmem:[#allocation8 + $0x8c] sm:$0xf]  ;;  %v2352_v61 = vld [vmem:[#allocation8 + $0x70] sm:$0xf0] }
  0x35   :  { %v2395_v53 = vor.u32 %v3290_v51, %v2392_v52  ;;  %v2376_v55 = vld [vmem:[#allocation8 + $0x98] sm:$0xf0]  ;;  %v2358_v62 = vld [vmem:[#allocation8 + $0x68] sm:$0xf]  ;;  %v3284_v63 = vld [vmem:[#allocation8 + $0x74] sm:$0xf0]  ;;  %v2355_v0 = vor.u32 %v3281_v59, %v2352_v61 }
  0x36   :  { %462 = vmatpush.bf16.msra.mxu1 %v2367_v38  ;;  %v2379_v56 = vor.u32 %v3286_v54, %v2376_v55  ;;  %v2359_v1 = vor.u32 %v3284_v63, %v2358_v62  ;;  %v3282_v2 = vld [vmem:[#allocation8 + $0x6c] sm:$0xf]  ;;  %v2360_v3 = vld [vmem:[#allocation8 + $0x78] sm:$0xf0]  ;;  %v2334_v5 = vld [vmem:[#allocation8 + $0x40] sm:$0xf] }
  0x37   :  { %240 = vmatpush.bf16.msra.mxu0 %v3264_v37  ;;  %476 = vmatpush.bf16.msra.mxu2 %v2371_v39  ;;  %v2363_v4 = vor.u32 %v3282_v2, %v2360_v3  ;;  %v3279_v6 = vld [vmem:[#allocation8 + $0x4c] sm:$0xf0]  ;;  %v3277_v7 = vld [vmem:[#allocation8 + $0x44] sm:$0xf]  ;;  %v2336_v9 = vld [vmem:[#allocation8 + $0x50] sm:$0xf0] }
  0x38   :  { %490 = vmatpush.bf16.msra.mxu3 %v2375_v40  ;;  %v2335_v8 = vor.u32 %v3279_v6, %v2334_v5  ;;  %v2342_v10 = vld [vmem:[#allocation8 + $0x48] sm:$0xf]  ;;  %v3280_v11 = vld [vmem:[#allocation8 + $0x54] sm:$0xf0]  ;;  %v2339_v12 = vor.u32 %v3277_v7, %v2336_v9  ;;  %v3278_v14 = vld [vmem:[#allocation8 + $0x4c] sm:$0xf] }
  0x39   :  { %v2343_v13 = vor.u32 %v3280_v11, %v2342_v10  ;;  %v2344_v15 = vld [vmem:[#allocation8 + $0x58] sm:$0xf0]  ;;  %v2318_v17 = vld [vmem:[#allocation8 + $0x20] sm:$0xf]  ;;  %v3275_v18 = vld [vmem:[#allocation8 + $0x2c] sm:$0xf0] }
  0x3a   :  { %463 = vmatpush.bf16.msra.mxu1 %v2351_v60  ;;  %v2347_v16 = vor.u32 %v3278_v14, %v2344_v15  ;;  %v3273_v19 = vld [vmem:[#allocation8 + $0x24] sm:$0xf]  ;;  %v2319_v20 = vor.u32 %v3275_v18, %v2318_v17  ;;  %v2320_v21 = vld [vmem:[#allocation8 + $0x30] sm:$0xf0]  ;;  %v2326_v22 = vld [vmem:[#allocation8 + $0x28] sm:$0xf] }
  0x3b   :  { %241 = vmatpush.bf16.msra.mxu0 %v3263_v41  ;;  %477 = vmatpush.bf16.msra.mxu2 %v2355_v0  ;;  %v3276_v23 = vld [vmem:[#allocation8 + $0x34] sm:$0xf0]  ;;  %v2323_v24 = vor.u32 %v3273_v19, %v2320_v21  ;;  %v3274_v26 = vld [vmem:[#allocation8 + $0x2c] sm:$0xf]  ;;  %v2328_v27 = vld [vmem:[#allocation8 + $0x38] sm:$0xf0] }
  0x3c   :  { %491 = vmatpush.bf16.msra.mxu3 %v2359_v1  ;;  %v2327_v25 = vor.u32 %v3276_v23, %v2326_v22  ;;  %v2331_v28 = vor.u32 %v3274_v26, %v2328_v27  ;;  %v2302_v29 = vld [vmem:[#allocation8] sm:$0xf]  ;;  %v3271_v30 = vld [vmem:[#allocation8 + $0xc] sm:$0xf0]  ;;  %v3269_v31 = vld [vmem:[#allocation8 + $0x4] sm:$0xf] }
  0x3d   :  { %v2303_v32 = vor.u32 %v3271_v30, %v2302_v29  ;;  %v2304_v33 = vld [vmem:[#allocation8 + $0x10] sm:$0xf0]  ;;  %v2310_v34 = vld [vmem:[#allocation8 + $0x8] sm:$0xf]  ;;  %v3272_v35 = vld [vmem:[#allocation8 + $0x14] sm:$0xf0] }
  0x3e   :  { %464 = vmatpush.bf16.msra.mxu1 %v2335_v8  ;;  %v2307_v36 = vor.u32 %v3269_v31, %v2304_v33  ;;  %v2311_v37 = vor.u32 %v3272_v35, %v2310_v34  ;;  %v3270_v38 = vld [vmem:[#allocation8 + $0xc] sm:$0xf]  ;;  %v2312_v39 = vld [vmem:[#allocation8 + $0x18] sm:$0xf0]  ;;  %v2542_v41 = vld [vmem:[#allocation11 + $0xe0] sm:$0xf] }
  0x3f   :  { %242 = vmatpush.bf16.msra.mxu0 %v3262_v42  ;;  %478 = vmatpush.bf16.msra.mxu2 %v2339_v12  ;;  %v2315_v40 = vor.u32 %v3270_v38, %v2312_v39  ;;  %v3331_v42 = vld [vmem:[#allocation11 + $0xec] sm:$0xf0]  ;;  %v2926_v43 = vld [vmem:[#allocation11 + $0x3e0] sm:$0xf] }
  0x40   :  { %492 = vmatpush.bf16.msra.mxu3 %v2343_v13  ;;  %v2543_v44 = vor.u32 %v3331_v42, %v2542_v41  ;;  %v3327_v47 = vld [vmem:[#allocation11 + $0xcc] sm:$0xf0]  ;;  %v2670_v51 = vld [vmem:[#allocation11 + $0x1e0] sm:$0xf] }
  0x41   :  { %v2798_v54 = vld [vmem:[#allocation11 + $0x2e0] sm:$0xf]  ;;  %v3395_v55 = vld [vmem:[#allocation11 + $0x2ec] sm:$0xf0] }
  0x42   :  { %465 = vmatpush.bf16.msra.mxu1 %v2319_v20  ;;  %v2799_v58 = vor.u32 %v3395_v55, %v2798_v54  ;;  %v2510_v59 = vld [vmem:[#allocation11 + $0xa0] sm:$0xf]  ;;  %v3323_v60 = vld [vmem:[#allocation11 + $0xac] sm:$0xf0] }
  0x43   :  { %243 = vmatpush.bf16.msra.mxu0 %v3261_v45  ;;  %479 = vmatpush.bf16.msra.mxu2 %v2323_v24  ;;  %v3427_v45 = vld [vmem:[#allocation11 + $0x3ec] sm:$0xf0]  ;;  %v2894_v61 = vld [vmem:[#allocation11 + $0x3a0] sm:$0xf] }
  0x44   :  { %493 = vmatpush.bf16.msra.mxu3 %v2327_v25  ;;  %v2927_v48 = vor.u32 %v3427_v45, %v2926_v43  ;;  %v3419_v62 = vld [vmem:[#allocation11 + $0x3ac] sm:$0xf0]  ;;  %v2654_v63 = vld [vmem:[#allocation11 + $0x1c0] sm:$0xf] }
  0x45   :  { %v3359_v0 = vld [vmem:[#allocation11 + $0x1cc] sm:$0xf0]  ;;  %v2782_v2 = vld [vmem:[#allocation11 + $0x2c0] sm:$0xf]  ;;  %v2895_v8 = vor.u32 %v3419_v62, %v2894_v61 }
  0x46   :  { %244 = vmatmul.bf16.vlgmr.msra.gmra.mxu0 %v3260_v49  ;;  %466 = vmatpush.bf16.msra.mxu1 %v2303_v32  ;;  %v2910_v49 = vld [vmem:[#allocation11 + $0x3c0] sm:$0xf]  ;;  %v2655_v1 = vor.u32 %v3359_v0, %v2654_v63  ;;  %v3391_v3 = vld [vmem:[#allocation11 + $0x2cc] sm:$0xf0] }
  0x47   :  { %501 = vmatpush.bf16.msrb.mxu0 %v2427_v46  ;;  %480 = vmatpush.bf16.msra.mxu2 %v2307_v36  ;;  %v2526_v46 = vld [vmem:[#allocation11 + $0xc0] sm:$0xf]  ;;  %v2783_v5 = vor.u32 %v3391_v3, %v2782_v2  ;;  %v3319_v7 = vld [vmem:[#allocation11 + $0x8c] sm:$0xf0] }
  0x48   :  { %494 = vmatpush.bf16.msra.mxu3 %v2311_v37  ;;  %v2527_v52 = vor.u32 %v3327_v47, %v2526_v46  ;;  %v2494_v6 = vld [vmem:[#allocation11 + $0x80] sm:$0xf]  ;;  %v3355_v10 = vld [vmem:[#allocation11 + $0x1ac] sm:$0xf0] }
  0x49   :  { %v2638_v9 = vld [vmem:[#allocation11 + $0x1a0] sm:$0xf]  ;;  %v3415_v13 = vld [vmem:[#allocation11 + $0x38c] sm:$0xf0]  ;;  %v2495_v18 = vor.u32 %v3319_v7, %v2494_v6  ;;  %v3425_v6 = vld [vmem:[#allocation11 + $0x3e4] sm:$0xf] }
  0x4a   :  { %1317 = vmatpush.bf16.msrb.mxu1 %v2543_v44  ;;  %v2766_v11 = vld [vmem:[#allocation11 + $0x2a0] sm:$0xf]  ;;  %v3387_v14 = vld [vmem:[#allocation11 + $0x2ac] sm:$0xf0]  ;;  %v2639_v15 = vor.u32 %v3355_v10, %v2638_v9  ;;  %v2928_v7 = vld [vmem:[#allocation11 + $0x3f0] sm:$0xf0] }
  0x4b   :  { %502 = vmatpush.bf16.msrb.mxu0 %v2411_v50  ;;  %v3423_v50 = vld [vmem:[#allocation11 + $0x3cc] sm:$0xf0]  ;;  %v2878_v12 = vld [vmem:[#allocation11 + $0x380] sm:$0xf] }
  0x4c   :  { %1345 = vmatpush.bf16.msrb.mxu3 %v2799_v58  ;;  %v2622_v17 = vld [vmem:[#allocation11 + $0x180] sm:$0xf]  ;;  %v3351_v19 = vld [vmem:[#allocation11 + $0x18c] sm:$0xf0]  ;;  %v2879_v22 = vor.u32 %v3415_v13, %v2878_v12 }
  0x4d   :  { %v2750_v20 = vld [vmem:[#allocation11 + $0x280] sm:$0xf]  ;;  %v3383_v21 = vld [vmem:[#allocation11 + $0x28c] sm:$0xf0]  ;;  %v2623_v27 = vor.u32 %v3351_v19, %v2622_v17 }
  0x4e   :  { %1318 = vmatpush.bf16.msrb.mxu1 %v2527_v52  ;;  %v2478_v23 = vld [vmem:[#allocation11 + $0x60] sm:$0xf]  ;;  %v3315_v24 = vld [vmem:[#allocation11 + $0x6c] sm:$0xf0] }
  0x4f   :  { %503 = vmatpush.bf16.msrb.mxu0 %v2395_v53  ;;  %v3363_v53 = vld [vmem:[#allocation11 + $0x1ec] sm:$0xf0]  ;;  %v2862_v25 = vld [vmem:[#allocation11 + $0x360] sm:$0xf]  ;;  %v2479_v30 = vor.u32 %v3315_v24, %v2478_v23  ;;  %v2931_v24 = vor.u32 %v3425_v6, %v2928_v7  ;;  %v3309_v7 = vld [vmem:[#allocation11 + $0x44] sm:$0xf] }
  0x50   :  { %v2671_v57 = vor.u32 %v3363_v53, %v2670_v51  ;;  %1346 = vmatpush.bf16.msrb.mxu3 %v2783_v5  ;;  %v3411_v26 = vld [vmem:[#allocation11 + $0x36c] sm:$0xf0]  ;;  %v2606_v29 = vld [vmem:[#allocation11 + $0x160] sm:$0xf]  ;;  %v2544_v5 = vld [vmem:[#allocation11 + $0xf0] sm:$0xf0] }
  0x51   :  { %v3347_v31 = vld [vmem:[#allocation11 + $0x16c] sm:$0xf0]  ;;  %v2734_v32 = vld [vmem:[#allocation11 + $0x260] sm:$0xf]  ;;  %v2863_v35 = vor.u32 %v3411_v26, %v2862_v25  ;;  %v3325_v25 = vld [vmem:[#allocation11 + $0xc4] sm:$0xf] }
  0x52   :  { %1331 = vmatpush.bf16.msrb.mxu2 %v2671_v57  ;;  %v3379_v33 = vld [vmem:[#allocation11 + $0x26c] sm:$0xf0]  ;;  %v2462_v36 = vld [vmem:[#allocation11 + $0x40] sm:$0xf]  ;;  %v2607_v41 = vor.u32 %v3347_v31, %v2606_v29  ;;  %v2528_v26 = vld [vmem:[#allocation11 + $0xd0] sm:$0xf0] }
  0x53   :  { %504 = vmatpush.bf16.msrb.mxu0 %v2379_v56  ;;  %v2911_v56 = vor.u32 %v3423_v50, %v2910_v49  ;;  %v3311_v37 = vld [vmem:[#allocation11 + $0x4c] sm:$0xf0]  ;;  %v2846_v38 = vld [vmem:[#allocation11 + $0x340] sm:$0xf]  ;;  %v2735_v42 = vor.u32 %v3379_v33, %v2734_v32  ;;  %v3357_v33 = vld [vmem:[#allocation11 + $0x1c4] sm:$0xf] }
  0x54   :  { %v3407_v39 = vld [vmem:[#allocation11 + $0x34c] sm:$0xf0]  ;;  %v2590_v43 = vld [vmem:[#allocation11 + $0x140] sm:$0xf]  ;;  %v2463_v44 = vor.u32 %v3311_v37, %v2462_v36  ;;  %v2784_v36 = vld [vmem:[#allocation11 + $0x2d0] sm:$0xf0]  ;;  %v2531_v37 = vor.u32 %v3325_v25, %v2528_v26 }
  0x55   :  { %v3343_v45 = vld [vmem:[#allocation11 + $0x14c] sm:$0xf0]  ;;  %v2718_v46 = vld [vmem:[#allocation11 + $0x240] sm:$0xf]  ;;  %v3341_v25 = vld [vmem:[#allocation11 + $0x144] sm:$0xf] }
  0x56   :  { %1332 = vmatpush.bf16.msrb.mxu2 %v2655_v1  ;;  %v3375_v47 = vld [vmem:[#allocation11 + $0x24c] sm:$0xf0]  ;;  %v2446_v49 = vld [vmem:[#allocation11 + $0x20] sm:$0xf]  ;;  %v2591_v53 = vor.u32 %v3343_v45, %v2590_v43  ;;  %v2592_v26 = vld [vmem:[#allocation11 + $0x150] sm:$0xf0] }
  0x57   :  { %505 = vmatpush.bf16.msrb.mxu0 %v2363_v4  ;;  %v2511_v4 = vor.u32 %v3323_v60, %v2510_v59  ;;  %v3307_v50 = vld [vmem:[#allocation11 + $0x2c] sm:$0xf0]  ;;  %v2830_v51 = vld [vmem:[#allocation11 + $0x320] sm:$0xf]  ;;  %v2719_v54 = vor.u32 %v3375_v47, %v2718_v46  ;;  %v3317_v47 = vld [vmem:[#allocation11 + $0x84] sm:$0xf] }
  0x58   :  { %v3403_v52 = vld [vmem:[#allocation11 + $0x32c] sm:$0xf0]  ;;  %v2574_v55 = vld [vmem:[#allocation11 + $0x120] sm:$0xf]  ;;  %v2447_v57 = vor.u32 %v3307_v50, %v2446_v49  ;;  %v3413_v49 = vld [vmem:[#allocation11 + $0x384] sm:$0xf] }
  0x59   :  { %1319 = vmatpush.bf16.msrb.mxu1 %v2511_v4  ;;  %v3339_v58 = vld [vmem:[#allocation11 + $0x12c] sm:$0xf0]  ;;  %v2702_v59 = vld [vmem:[#allocation11 + $0x220] sm:$0xf]  ;;  %v2831_v62 = vor.u32 %v3403_v52, %v2830_v51  ;;  %v3329_v4 = vld [vmem:[#allocation11 + $0xe4] sm:$0xf] }
  0x5a   :  { %1333 = vmatpush.bf16.msrb.mxu2 %v2639_v15  ;;  %v3371_v60 = vld [vmem:[#allocation11 + $0x22c] sm:$0xf0]  ;;  %v2430_v63 = vld [vmem:[#allocation11] sm:$0xf]  ;;  %v2547_v23 = vor.u32 %v3329_v4, %v2544_v5  ;;  %v2880_v50 = vld [vmem:[#allocation11 + $0x390] sm:$0xf0] }
  0x5b   :  { %506 = vmatpush.bf16.msrb.mxu0 %v2347_v16  ;;  %v2767_v16 = vor.u32 %v3387_v14, %v2766_v11  ;;  %v3303_v0 = vld [vmem:[#allocation11 + $0xc] sm:$0xf0]  ;;  %v2814_v2 = vld [vmem:[#allocation11 + $0x300] sm:$0xf]  ;;  %v2703_v9 = vor.u32 %v3371_v60, %v2702_v59  ;;  %v2883_v52 = vor.u32 %v3413_v49, %v2880_v50  ;;  %v3313_v59 = vld [vmem:[#allocation11 + $0x64] sm:$0xf] }
  0x5c   :  { %v3399_v3 = vld [vmem:[#allocation11 + $0x30c] sm:$0xf0]  ;;  %v2558_v12 = vld [vmem:[#allocation11 + $0x100] sm:$0xf]  ;;  %v2480_v60 = vld [vmem:[#allocation11 + $0x70] sm:$0xf0] }
  0x5d   :  { %1347 = vmatpush.bf16.msrb.mxu3 %v2767_v16  ;;  %1320 = vmatpush.bf16.msrb.mxu1 %v2495_v18  ;;  %v3335_v13 = vld [vmem:[#allocation11 + $0x10c] sm:$0xf0]  ;;  %v2686_v14 = vld [vmem:[#allocation11 + $0x200] sm:$0xf]  ;;  %v3361_v16 = vld [vmem:[#allocation11 + $0x1e4] sm:$0xf]  ;;  %v2431_v18 = vor.u32 %v3303_v0, %v2430_v63  ;;  %v2815_v19 = vor.u32 %v3399_v3, %v2814_v2 }
  0x5e   :  { %1334 = vmatpush.bf16.msrb.mxu2 %v2623_v27  ;;  %v3367_v15 = vld [vmem:[#allocation11 + $0x20c] sm:$0xf0]  ;;  %v3421_v27 = vld [vmem:[#allocation11 + $0x3c4] sm:$0xf]  ;;  %v2559_v29 = vor.u32 %v3335_v13, %v2558_v12  ;;  %v2864_v63 = vld [vmem:[#allocation11 + $0x370] sm:$0xf0] }
  0x5f   :  { %507 = vmatpush.bf16.msrb.mxu0 %v2331_v28  ;;  %v2751_v28 = vor.u32 %v3383_v21, %v2750_v20  ;;  %v2672_v20 = vld [vmem:[#allocation11 + $0x1f0] sm:$0xf0]  ;;  %v3393_v21 = vld [vmem:[#allocation11 + $0x2e4] sm:$0xf]  ;;  %v289_v49 = vld [vmem:[#allocation10] sm:$0xf] }
  0x60   :  { %v2675_v31 = vor.u32 %v3361_v16, %v2672_v20  ;;  %v2624_v2 = vld [vmem:[#allocation11 + $0x190] sm:$0xf0]  ;;  %v3381_v3 = vld [vmem:[#allocation11 + $0x284] sm:$0xf] }
  0x61   :  { %1348 = vmatpush.bf16.msrb.mxu3 %v2751_v28  ;;  %1321 = vmatpush.bf16.msrb.mxu1 %v2479_v30  ;;  %v2912_v28 = vld [vmem:[#allocation11 + $0x3d0] sm:$0xf0]  ;;  %v2687_v30 = vor.u32 %v3367_v15, %v2686_v14  ;;  %v3345_v13 = vld [vmem:[#allocation11 + $0x164] sm:$0xf] }
  0x62   :  { %1335 = vmatpush.bf16.msrb.mxu2 %v2607_v41  ;;  %v3417_v41 = vld [vmem:[#allocation11 + $0x3a4] sm:$0xf]  ;;  %v2752_v5 = vld [vmem:[#allocation11 + $0x290] sm:$0xf0] }
  0x63   :  { %508 = vmatpush.bf16.msrb.mxu0 %v2315_v40  ;;  %v3524_v40 = vld [vmem:[#allocation7] ss:$0 sm:$0xff]  ;;  %v2755_v6 = vor.u32 %v3381_v3, %v2752_v5  ;;  %v2608_v14 = vld [vmem:[#allocation11 + $0x170] sm:$0xf0]  ;;  %v3377_v16 = vld [vmem:[#allocation11 + $0x264] sm:$0xf] }
  0x64   :  { %v2611_v15 = vor.u32 %v3345_v13, %v2608_v14  ;;  %v2448_v20 = vld [vmem:[#allocation11 + $0x30] sm:$0xf0]  ;;  %v3428_v3 = vld [vmem:[#allocation11 + $0x3f4] sm:$0xf0] }
  0x65   :  { %1349 = vmatpush.bf16.msrb.mxu3 %v2735_v42  ;;  %1322 = vmatpush.bf16.msrb.mxu1 %v2463_v44  ;;  %v2896_v42 = vld [vmem:[#allocation11 + $0x3b0] sm:$0xf0]  ;;  %v3328_v13 = vld [vmem:[#allocation11 + $0xd4] sm:$0xf0] }
  0x66   :  { %1336 = vmatpush.bf16.msrb.mxu2 %v2591_v53  ;;  %v2899_v46 = vor.u32 %v3417_v41, %v2896_v42  ;;  %v3353_v53 = vld [vmem:[#allocation11 + $0x1a4] sm:$0xf]  ;;  %v2704_v41 = vld [vmem:[#allocation11 + $0x230] sm:$0xf0] }
  0x67   :  { %1359 = vmatpush.bf16.msra.mxu0 %v2927_v48  ;;  %v2847_v48 = vor.u32 %v3407_v39, %v2846_v38  ;;  %v2915_v38 = vor.u32 %v3421_v27, %v2912_v28  ;;  %v3321_v39 = vld [vmem:[#allocation11 + $0xa4] sm:$0xf]  ;;  %v2595_v28 = vor.u32 %v3341_v25, %v2592_v26  ;;  %v2806_v25 = vld [vmem:[#allocation11 + $0x2e8] sm:$0xf]  ;;  %v3396_v26 = vld [vmem:[#allocation11 + $0x2f4] sm:$0xf0] }
  0x68   :  { %v3373_v27 = vld [vmem:[#allocation11 + $0x244] sm:$0xf] }
  0x69   :  { %1350 = vmatpush.bf16.msrb.mxu3 %v2719_v54  ;;  %1323 = vmatpush.bf16.msrb.mxu1 %v2447_v57  ;;  %v2640_v54 = vld [vmem:[#allocation11 + $0x1b0] sm:$0xf0] }
  0x6a   :  { %v2768_v57 = vld [vmem:[#allocation11 + $0x2b0] sm:$0xf0] }
  0x6b   :  { %1360 = vmatpush.bf16.msra.mxu0 %v2911_v56 }
  0x6d   :  { %1351 = vmatpush.bf16.msrb.mxu3 %v2703_v9  ;;  %1324 = vmatpush.bf16.msrb.mxu1 %v2431_v18 }
  0x6f   :  { %1361 = vmatpush.bf16.msra.mxu0 %v2895_v8  ;;  %v2575_v8 = vor.u32 %v3339_v58, %v2574_v55  ;;  %v3385_v55 = vld [vmem:[#allocation11 + $0x2a4] sm:$0xf] }
  0x70   :  { %v2771_v58 = vor.u32 %v3385_v55, %v2768_v57 }
  0x71   :  { %1337 = vmatpush.bf16.msrb.mxu2 %v2575_v8  ;;  %1352 = vmatpush.bf16.msrb.mxu3 %v2687_v30  ;;  %v2464_v8 = vld [vmem:[#allocation11 + $0x50] sm:$0xf0] }
  0x72   :  { %v2467_v9 = vor.u32 %v3309_v7, %v2464_v8 }
  0x73   :  { %1362 = vmatpush.bf16.msra.mxu0 %v2879_v22  ;;  %v2800_v22 = vld [vmem:[#allocation11 + $0x2f0] sm:$0xf0] }
  0x74   :  { %v2803_v32 = vor.u32 %v3393_v21, %v2800_v22  ;;  %v3401_v21 = vld [vmem:[#allocation11 + $0x324] sm:$0xf] }
  0x75   :  { %1338 = vmatpush.bf16.msrb.mxu2 %v2559_v29  ;;  %v2720_v29 = vld [vmem:[#allocation11 + $0x250] sm:$0xf0] }
  0x76   :  { %v2723_v30 = vor.u32 %v3373_v27, %v2720_v29 }
  0x77   :  { %1363 = vmatpush.bf16.msra.mxu0 %v2863_v35  ;;  %v3389_v35 = vld [vmem:[#allocation11 + $0x2c4] sm:$0xf] }
  0x78   :  { %v2787_v44 = vor.u32 %v3389_v35, %v2784_v36  ;;  %v2816_v35 = vld [vmem:[#allocation11 + $0x310] sm:$0xf0] }
  0x7b   :  { %1364 = vmatpush.bf16.msra.mxu0 %v2847_v48  ;;  %v2496_v48 = vld [vmem:[#allocation11 + $0x90] sm:$0xf0] }
  0x7c   :  { %v2499_v51 = vor.u32 %v3317_v47, %v2496_v48  ;;  %v2688_v47 = vld [vmem:[#allocation11 + $0x210] sm:$0xf0] }
  0x7f   :  { %1365 = vmatpush.bf16.msra.mxu0 %v2831_v62  ;;  %v3409_v62 = vld [vmem:[#allocation11 + $0x364] sm:$0xf] }
  0x80   :  { %v2867_v0 = vor.u32 %v3409_v62, %v2864_v63  ;;  %v2550_v62 = vld [vmem:[#allocation11 + $0xe8] sm:$0xf]  ;;  %v3332_v63 = vld [vmem:[#allocation11 + $0xf4] sm:$0xf0] }
  0x81   :  { %v2551_v8 = vor.u32 %v3332_v63, %v2550_v62  ;;  %v3412_v62 = vld [vmem:[#allocation11 + $0x374] sm:$0xf0] }
  0x83   :  { %1366 = vmatpush.bf16.msra.mxu0 %v2815_v19  ;;  %v3305_v19 = vld [vmem:[#allocation11 + $0x24] sm:$0xf] }
  0x84   :  { %v2451_v22 = vor.u32 %v3305_v19, %v2448_v20 }
  0xc3   :  { %v245_v34 = vpop.f32.mrf.mxu0 }
  0xc4   :  { %v246_v56 = vadd.f32 %v3524_v40, %v245_v34  ;;  %v2656_v34 = vld [vmem:[#allocation11 + $0x1d0] sm:$0xf0] }
  0xc5   :  { %v2659_v43 = vor.u32 %v3357_v33, %v2656_v34  ;;  %v3397_v33 = vld [vmem:[#allocation11 + $0x304] sm:$0xf] }
  0xc6   :  { %v254_v10 = vmax.f32 %v246_v56, 0.0  ;;  %v2643_v56 = vor.u32 %v3353_v53, %v2640_v54  ;;  %v2819_v36 = vor.u32 %v3397_v33, %v2816_v35  ;;  %v294_v53 = vperm.slane %v289_v49, 3  ;;  %v2902_v35 = vld [vmem:[#allocation11 + $0x3a8] sm:$0xf] }
  0xcb   :  { %v247_v61 = vpop.f32.mrf.mxu0 }
  0xcc   :  { %v248_v1 = vadd.f32 %v3524_v40, %v247_v61  ;;  %v2512_v40 = vld [vmem:[#allocation11 + $0xb0] sm:$0xf0]  ;;  %v2483_v61 = vor.u32 %v3313_v59, %v2480_v60  ;;  %v292_v59 = vperm.slane %v289_v49, 1 }
  0xcd   :  { %v2515_v45 = vor.u32 %v3321_v39, %v2512_v40  ;;  %v3369_v39 = vld [vmem:[#allocation11 + $0x224] sm:$0xf] }
  0xce   :  { %v255_v11 = vmax.f32 %v248_v1, 0.0  ;;  %v3349_v1 = vld [vmem:[#allocation11 + $0x184] sm:$0xf]  ;;  %v2707_v42 = vor.u32 %v3369_v39, %v2704_v41  ;;  %v2662_v39 = vld [vmem:[#allocation11 + $0x1c8] sm:$0xf] }
  0xcf   :  { %v2627_v4 = vor.u32 %v3349_v1, %v2624_v2  ;;  %v2934_v2 = vld [vmem:[#allocation11 + $0x3e8] sm:$0xf] }
  0xd0   :  { %v256_v17 = vpack.c.bf16 %v255_v11, %v254_v10  ;;  %v3405_v10 = vld [vmem:[#allocation11 + $0x344] sm:$0xf]  ;;  %v2848_v11 = vld [vmem:[#allocation11 + $0x350] sm:$0xf0] }
  0xd1   :  { %v2851_v12 = vor.u32 %v3405_v10, %v2848_v11  ;;  %v2935_v11 = vor.u32 %v3428_v3, %v2934_v2  ;;  %v2758_v3 = vld [vmem:[#allocation11 + $0x288] sm:$0xf] }
  0xd2   :  { %467 = vmatmul.bf16.vlgmr.msra.gmra.mxu1 %v256_v17  ;;  %481 = vmatmul.bf16.vlgmr.msra.gmra.mxu2 %v256_v17 }
  0xd3   :  { %495 = vmatmul.bf16.vlgmr.msra.gmra.mxu3 %v256_v17  ;;  %509 = vmatmul.bf16.vlgmr.msrb.gmra.mxu0 %v256_v17  ;;  %v2736_v17 = vld [vmem:[#allocation11 + $0x270] sm:$0xf0] }
  0xd4   :  { %1373 = vmatpush.bf16.msra.mxu1 %v2547_v23  ;;  %1415 = vmatpush.bf16.msrb.mxu0 %v2931_v24  ;;  %v2739_v18 = vor.u32 %v3377_v16, %v2736_v17  ;;  %v2832_v23 = vld [vmem:[#allocation11 + $0x330] sm:$0xf0]  ;;  %v2918_v17 = vld [vmem:[#allocation11 + $0x3c8] sm:$0xf] }
  0xd5   :  { %1387 = vmatpush.bf16.msra.mxu2 %v2675_v31  ;;  %1401 = vmatpush.bf16.msra.mxu3 %v2803_v32  ;;  %v2835_v24 = vor.u32 %v3401_v21, %v2832_v23  ;;  %v3301_v31 = vld [vmem:[#allocation11 + $0x4] sm:$0xf]  ;;  %v2432_v32 = vld [vmem:[#allocation11 + $0x10] sm:$0xf0]  ;;  %v2678_v21 = vld [vmem:[#allocation11 + $0x1e8] sm:$0xf] }
  0xd6   :  { %v2435_v34 = vor.u32 %v3301_v31, %v2432_v32  ;;  %v3324_v31 = vld [vmem:[#allocation11 + $0xb4] sm:$0xf0] }
  0xd8   :  { %1374 = vmatpush.bf16.msra.mxu1 %v2531_v37  ;;  %1416 = vmatpush.bf16.msrb.mxu0 %v2915_v38  ;;  %v3337_v37 = vld [vmem:[#allocation11 + $0x124] sm:$0xf]  ;;  %v2576_v38 = vld [vmem:[#allocation11 + $0x130] sm:$0xf0] }
  0xd9   :  { %1388 = vmatpush.bf16.msra.mxu2 %v2659_v43  ;;  %1402 = vmatpush.bf16.msra.mxu3 %v2787_v44  ;;  %v2579_v40 = vor.u32 %v3337_v37, %v2576_v38  ;;  %v3333_v43 = vld [vmem:[#allocation11 + $0x104] sm:$0xf]  ;;  %v2560_v44 = vld [vmem:[#allocation11 + $0x110] sm:$0xf0]  ;;  %v2807_v38 = vor.u32 %v3396_v26, %v2806_v25  ;;  %v2598_v26 = vld [vmem:[#allocation11 + $0x148] sm:$0xf] }
  0xdc   :  { %1375 = vmatpush.bf16.msra.mxu1 %v2515_v45  ;;  %1417 = vmatpush.bf16.msrb.mxu0 %v2899_v46  ;;  %v2563_v45 = vor.u32 %v3333_v43, %v2560_v44  ;;  %v3365_v46 = vld [vmem:[#allocation11 + $0x204] sm:$0xf]  ;;  %v2790_v43 = vld [vmem:[#allocation11 + $0x2c8] sm:$0xf]  ;;  %v3392_v44 = vld [vmem:[#allocation11 + $0x2d4] sm:$0xf0] }
  0xdd   :  { %1389 = vmatpush.bf16.msra.mxu2 %v2643_v56  ;;  %1403 = vmatpush.bf16.msra.mxu3 %v2771_v58  ;;  %v2691_v48 = vor.u32 %v3365_v46, %v2688_v47  ;;  %v2502_v46 = vld [vmem:[#allocation11 + $0x88] sm:$0xf]  ;;  %v3320_v47 = vld [vmem:[#allocation11 + $0x94] sm:$0xf0] }
  0xe0   :  { %1376 = vmatpush.bf16.msra.mxu1 %v2499_v51  ;;  %1418 = vmatpush.bf16.msrb.mxu0 %v2883_v52  ;;  %v291_v52 = vperm.slane %v289_v49, 0 }
  0xe1   :  { %1390 = vmatpush.bf16.msra.mxu2 %v2627_v4  ;;  %1404 = vmatpush.bf16.msra.mxu3 %v2755_v6 }
  0xe4   :  { %1377 = vmatpush.bf16.msra.mxu1 %v2483_v61  ;;  %1419 = vmatpush.bf16.msrb.mxu0 %v2867_v0  ;;  %v293_v0 = vperm.slane %v289_v49, 2  ;;  %v2886_v49 = vld [vmem:[#allocation11 + $0x388] sm:$0xf] }
  0xe5   :  { %1391 = vmatpush.bf16.msra.mxu2 %v2611_v15  ;;  %1405 = vmatpush.bf16.msra.mxu3 %v2739_v18  ;;  %v3424_v18 = vld [vmem:[#allocation11 + $0x3d4] sm:$0xf0] }
  0xe6   :  { %v2919_v29 = vor.u32 %v3424_v18, %v2918_v17  ;;  %v2742_v17 = vld [vmem:[#allocation11 + $0x268] sm:$0xf]  ;;  %v3380_v18 = vld [vmem:[#allocation11 + $0x274] sm:$0xf0] }
  0xe7   :  { %v2743_v25 = vor.u32 %v3380_v18, %v2742_v17  ;;  %v3390_v17 = vld [vmem:[#allocation11 + $0x2cc] sm:$0xf]  ;;  %v2792_v18 = vld [vmem:[#allocation11 + $0x2d8] sm:$0xf0] }
  0xe8   :  { %1378 = vmatpush.bf16.msra.mxu1 %v2467_v9  ;;  %1420 = vmatpush.bf16.msrb.mxu0 %v2851_v12  ;;  %v2534_v12 = vld [vmem:[#allocation11 + $0xc8] sm:$0xf] }
  0xe9   :  { %1392 = vmatpush.bf16.msra.mxu2 %v2595_v28  ;;  %1406 = vmatpush.bf16.msra.mxu3 %v2723_v30  ;;  %v2518_v30 = vld [vmem:[#allocation11 + $0xa8] sm:$0xf] }
  0xec   :  { %1379 = vmatpush.bf16.msra.mxu1 %v2451_v22  ;;  %1421 = vmatpush.bf16.msrb.mxu0 %v2835_v24  ;;  %v3364_v22 = vld [vmem:[#allocation11 + $0x1f4] sm:$0xf0]  ;;  %v2535_v24 = vor.u32 %v3328_v13, %v2534_v12  ;;  %v2614_v13 = vld [vmem:[#allocation11 + $0x168] sm:$0xf] }
  0xed   :  { %1393 = vmatpush.bf16.msra.mxu2 %v2579_v40  ;;  %1407 = vmatpush.bf16.msra.mxu3 %v2707_v42  ;;  %v3360_v40 = vld [vmem:[#allocation11 + $0x1d4] sm:$0xf0]  ;;  %v2519_v42 = vor.u32 %v3324_v31, %v2518_v30  ;;  %v2438_v31 = vld [vmem:[#allocation11 + $0x8] sm:$0xf] }
  0xee   :  { %v3376_v30 = vld [vmem:[#allocation11 + $0x254] sm:$0xf0] }
  0xf0   :  { %1380 = vmatpush.bf16.msra.mxu1 %v2435_v34  ;;  %1422 = vmatpush.bf16.msrb.mxu0 %v2819_v36  ;;  %v2679_v34 = vor.u32 %v3364_v22, %v2678_v21  ;;  %v3420_v36 = vld [vmem:[#allocation11 + $0x3b4] sm:$0xf0] }
  0xf1   :  { %1394 = vmatpush.bf16.msra.mxu2 %v2563_v45  ;;  %1408 = vmatpush.bf16.msra.mxu3 %v2691_v48  ;;  %v2903_v45 = vor.u32 %v3420_v36, %v2902_v35  ;;  %v2663_v48 = vor.u32 %v3360_v40, %v2662_v39  ;;  %v3308_v21 = vld [vmem:[#allocation11 + $0x34] sm:$0xf0]  ;;  %v2552_v39 = vld [vmem:[#allocation11 + $0xf8] sm:$0xf0]  ;;  %v3426_v40 = vld [vmem:[#allocation11 + $0x3ec] sm:$0xf] }
  0xf2   :  { %v3400_v35 = vld [vmem:[#allocation11 + $0x314] sm:$0xf0] }
 0x14f   :  { %v468_v50 = vpop.f32.mrf.mxu1 }
 0x150   :  { %v510_v51 = vpop.f32.mrf.mxu0  ;;  %v469_v55 = vadd.f32 %v468_v50, %v291_v52  ;;  %v3416_v50 = vld [vmem:[#allocation11 + $0x394] sm:$0xf0] }
 0x151   :  { %v511_v57 = vadd.f32 %v510_v51, %v294_v53  ;;  %v2791_v51 = vor.u32 %v3392_v44, %v2790_v43  ;;  %v2936_v43 = vld [vmem:[#allocation11 + $0x3f8] sm:$0xf0]  ;;  %v2582_v44 = vld [vmem:[#allocation11 + $0x128] sm:$0xf] }
 0x152   :  { %v527_v4 = vmax.f32 %v469_v55, 0.0  ;;  %v2774_v55 = vld [vmem:[#allocation11 + $0x2a8] sm:$0xf] }
 0x153   :  { %v530_v6 = vmax.f32 %v511_v57, 0.0  ;;  %v2887_v57 = vor.u32 %v3416_v50, %v2886_v49 }
 0x155   :  { %v482_v54 = vpop.f32.mrf.mxu2 }
 0x156   :  { %v496_v56 = vpop.f32.mrf.mxu3  ;;  %v483_v9 = vadd.f32 %v482_v54, %v292_v59  ;;  %v2503_v54 = vor.u32 %v3320_v47, %v2502_v46  ;;  %v2710_v47 = vld [vmem:[#allocation11 + $0x228] sm:$0xf] }
 0x157   :  { %v470_v58 = vpop.f32.mrf.mxu1  ;;  %v497_v14 = vadd.f32 %v496_v56, %v293_v0  ;;  %v3388_v56 = vld [vmem:[#allocation11 + $0x2b4] sm:$0xf0] }
 0x158   :  { %v471_v60 = vadd.f32 %v470_v58, %v291_v52  ;;  %v512_v61 = vpop.f32.mrf.mxu0  ;;  %v528_v27 = vmax.f32 %v483_v9, 0.0  ;;  %v2646_v52 = vld [vmem:[#allocation11 + $0x1a8] sm:$0xf]  ;;  %v2775_v63 = vor.u32 %v3388_v56, %v2774_v55  ;;  %v3422_v55 = vld [vmem:[#allocation11 + $0x3cc] sm:$0xf] }
 0x159   :  { %v513_v1 = vadd.f32 %v512_v61, %v294_v53  ;;  %v529_v32 = vmax.f32 %v497_v14, 0.0  ;;  %v3356_v53 = vld [vmem:[#allocation11 + $0x1b4] sm:$0xf0]  ;;  %v2486_v58 = vld [vmem:[#allocation11 + $0x68] sm:$0xf] }
 0x15a   :  { %v531_v5 = vmax.f32 %v471_v60, 0.0  ;;  %v2647_v60 = vor.u32 %v3356_v53, %v2646_v52  ;;  %v2870_v61 = vld [vmem:[#allocation11 + $0x368] sm:$0xf]  ;;  %v3348_v14 = vld [vmem:[#allocation11 + $0x174] sm:$0xf0]  ;;  %v2939_v52 = vor.u32 %v3426_v40, %v2936_v43 }
 0x15b   :  { %v534_v7 = vmax.f32 %v513_v1, 0.0  ;;  %v3352_v1 = vld [vmem:[#allocation11 + $0x194] sm:$0xf0]  ;;  %v2854_v9 = vld [vmem:[#allocation11 + $0x348] sm:$0xf]  ;;  %v2615_v22 = vor.u32 %v3348_v14, %v2614_v13 }
 0x15c   :  { %v3865_v10 = vpack.c.bf16 %v531_v5, %v527_v4  ;;  %v3384_v4 = vld [vmem:[#allocation11 + $0x294] sm:$0xf0]  ;;  %v2871_v5 = vor.u32 %v3412_v62, %v2870_v61  ;;  %v2920_v56 = vld [vmem:[#allocation11 + $0x3d8] sm:$0xf0]  ;;  %v3362_v62 = vld [vmem:[#allocation11 + $0x1ec] sm:$0xf] }
 0x15d   :  { %v3867_v15 = vpack.c.bf16 %v534_v7, %v530_v6  ;;  %v484_v16 = vpop.f32.mrf.mxu2  ;;  %v2470_v6 = vld [vmem:[#allocation11 + $0x48] sm:$0xf]  ;;  %v3312_v7 = vld [vmem:[#allocation11 + $0x54] sm:$0xf0]  ;;  %v2759_v12 = vor.u32 %v3384_v4, %v2758_v3  ;;  %v2923_v3 = vor.u32 %v3422_v55, %v2920_v56  ;;  %v3358_v13 = vld [vmem:[#allocation11 + $0x1cc] sm:$0xf] }
 0x15e   :  { %v485_v19 = vadd.f32 %v484_v16, %v292_v59  ;;  %v498_v20 = vpop.f32.mrf.mxu3  ;;  %1325 = vmatmul.bf16.vlgmr.msrb.gmra.mxu1 %v3865_v10  ;;  %v3316_v59 = vld [vmem:[#allocation11 + $0x74] sm:$0xf0]  ;;  %v2471_v16 = vor.u32 %v3312_v7, %v2470_v6  ;;  %v2520_v6 = vld [vmem:[#allocation11 + $0xb8] sm:$0xf0]  ;;  %v3382_v43 = vld [vmem:[#allocation11 + $0x28c] sm:$0xf] }
 0x15f   :  { %v499_v23 = vadd.f32 %v498_v20, %v293_v0  ;;  %1367 = vmatmul.bf16.vlgmr.msra.gmra.mxu0 %v3867_v15  ;;  %1429 = vmatpush.bf16.msrb.mxu1 %v2551_v8  ;;  %v2630_v0 = vld [vmem:[#allocation11 + $0x188] sm:$0xf]  ;;  %v2487_v2 = vor.u32 %v3316_v59, %v2486_v58  ;;  %v3336_v59 = vld [vmem:[#allocation11 + $0x114] sm:$0xf0]  ;;  %v2664_v14 = vld [vmem:[#allocation11 + $0x1d8] sm:$0xf0] }
 0x160   :  { %v532_v28 = vmax.f32 %v485_v19, 0.0  ;;  %1471 = vmatpush.bf16.msra.mxu0 %v2935_v11  ;;  %v2631_v8 = vor.u32 %v3352_v1, %v2630_v0  ;;  %v3408_v11 = vld [vmem:[#allocation11 + $0x354] sm:$0xf0]  ;;  %v2454_v20 = vld [vmem:[#allocation11 + $0x28] sm:$0xf] }
 0x161   :  { %v533_v33 = vmax.f32 %v499_v23, 0.0  ;;  %v2855_v19 = vor.u32 %v3408_v11, %v2854_v9  ;;  %v2838_v23 = vld [vmem:[#allocation11 + $0x328] sm:$0xf]  ;;  %v3368_v61 = vld [vmem:[#allocation11 + $0x214] sm:$0xf0] }
 0x162   :  { %v3871_v37 = vpack.c.bf16 %v532_v28, %v528_v27  ;;  %v3344_v27 = vld [vmem:[#allocation11 + $0x154] sm:$0xf0]  ;;  %v2455_v28 = vor.u32 %v3308_v21, %v2454_v20  ;;  %v2566_v58 = vld [vmem:[#allocation11 + $0x108] sm:$0xf]  ;;  %v3394_v1 = vld [vmem:[#allocation11 + $0x2ec] sm:$0xf] }
 0x163   :  { %v3873_v41 = vpack.c.bf16 %v533_v33, %v529_v32  ;;  %1430 = vmatpush.bf16.msrb.mxu1 %v2535_v24  ;;  %v3404_v24 = vld [vmem:[#allocation11 + $0x334] sm:$0xf0]  ;;  %v2599_v36 = vor.u32 %v3344_v27, %v2598_v26  ;;  %v2567_v4 = vor.u32 %v3336_v59, %v2566_v58  ;;  %v3418_v9 = vld [vmem:[#allocation11 + $0x3ac] sm:$0xf]  ;;  %v2904_v11 = vld [vmem:[#allocation11 + $0x3b8] sm:$0xf0] }
 0x164   :  { %1472 = vmatpush.bf16.msra.mxu0 %v2919_v29  ;;  %1339 = vmatmul.bf16.vlgmr.msrb.gmra.mxu2 %v3871_v37  ;;  %v2726_v29 = vld [vmem:[#allocation11 + $0x248] sm:$0xf]  ;;  %v2839_v32 = vor.u32 %v3404_v24, %v2838_v23  ;;  %v3304_v33 = vld [vmem:[#allocation11 + $0x14] sm:$0xf0]  ;;  %v3318_v20 = vld [vmem:[#allocation11 + $0x8c] sm:$0xf] }
 0x165   :  { %1353 = vmatmul.bf16.vlgmr.msrb.gmra.mxu3 %v3873_v41  ;;  %1443 = vmatpush.bf16.msrb.mxu2 %v2679_v34  ;;  %v2822_v34 = vld [vmem:[#allocation11 + $0x308] sm:$0xf]  ;;  %v2439_v46 = vor.u32 %v3304_v33, %v2438_v31  ;;  %v2504_v21 = vld [vmem:[#allocation11 + $0x98] sm:$0xf0]  ;;  %v3414_v23 = vld [vmem:[#allocation11 + $0x38c] sm:$0xf] }
 0x166   :  { %1457 = vmatpush.bf16.msrb.mxu3 %v2807_v38  ;;  %v3330_v38 = vld [vmem:[#allocation11 + $0xec] sm:$0xf]  ;;  %v2823_v49 = vor.u32 %v3400_v35, %v2822_v34  ;;  %v2888_v24 = vld [vmem:[#allocation11 + $0x398] sm:$0xf0] }
 0x167   :  { %1431 = vmatpush.bf16.msrb.mxu1 %v2519_v42  ;;  %v2727_v42 = vor.u32 %v3376_v30, %v2726_v29  ;;  %v2555_v50 = vor.u32 %v3330_v38, %v2552_v39  ;;  %v3354_v26 = vld [vmem:[#allocation11 + $0x1ac] sm:$0xf]  ;;  %v2648_v27 = vld [vmem:[#allocation11 + $0x1b8] sm:$0xf0]  ;;  %v2891_v31 = vor.u32 %v3414_v23, %v2888_v24  ;;  %v2990_v24 = vld [vmem:[#allocation13 + $0x60] sm:$0xf] }
 0x168   :  { %1473 = vmatpush.bf16.msra.mxu0 %v2903_v45  ;;  %v3340_v45 = vld [vmem:[#allocation11 + $0x134] sm:$0xf0]  ;;  %v3386_v29 = vld [vmem:[#allocation11 + $0x2ac] sm:$0xf]  ;;  %v2776_v30 = vld [vmem:[#allocation11 + $0x2b8] sm:$0xf0]  ;;  %v2651_v34 = vor.u32 %v3354_v26, %v2648_v27 }
 0x169   :  { %1444 = vmatpush.bf16.msrb.mxu2 %v2663_v48  ;;  %v3372_v48 = vld [vmem:[#allocation11 + $0x234] sm:$0xf0]  ;;  %v2583_v53 = vor.u32 %v3340_v45, %v2582_v44  ;;  %v2488_v33 = vld [vmem:[#allocation11 + $0x78] sm:$0xf0]  ;;  %v3410_v35 = vld [vmem:[#allocation11 + $0x36c] sm:$0xf]  ;;  %v2779_v38 = vor.u32 %v3386_v29, %v2776_v30 }
 0x16a   :  { %1458 = vmatpush.bf16.msrb.mxu3 %v2791_v51  ;;  %v3326_v51 = vld [vmem:[#allocation11 + $0xcc] sm:$0xf]  ;;  %v2632_v40 = vld [vmem:[#allocation11 + $0x198] sm:$0xf0] }
 0x16b   :  { %1432 = vmatpush.bf16.msrb.mxu1 %v2503_v54  ;;  %v2536_v54 = vld [vmem:[#allocation11 + $0xd8] sm:$0xf0]  ;;  %v3350_v39 = vld [vmem:[#allocation11 + $0x18c] sm:$0xf] }
 0x16c   :  { %1474 = vmatpush.bf16.msra.mxu0 %v2887_v57  ;;  %v2711_v57 = vor.u32 %v3372_v48, %v2710_v47  ;;  %v2539_v0 = vor.u32 %v3326_v51, %v2536_v54  ;;  %v2760_v44 = vld [vmem:[#allocation11 + $0x298] sm:$0xf0]  ;;  %v2635_v48 = vor.u32 %v3350_v39, %v2632_v40  ;;  %v3378_v55 = vld [vmem:[#allocation11 + $0x26c] sm:$0xf]  ;;  %v3438_v39 = vld [vmem:[#allocation13 + $0x44] sm:$0xf0] }
 0x16d   :  { %1445 = vmatpush.bf16.msrb.mxu2 %v2647_v60  ;;  %v2694_v60 = vld [vmem:[#allocation11 + $0x208] sm:$0xf]  ;;  %v2472_v47 = vld [vmem:[#allocation11 + $0x58] sm:$0xf0]  ;;  %v2763_v51 = vor.u32 %v3382_v43, %v2760_v44  ;;  %v3306_v58 = vld [vmem:[#allocation11 + $0x2c] sm:$0xf] }
 0x16e   :  { %1459 = vmatpush.bf16.msrb.mxu3 %v2775_v63  ;;  %1381 = vmatmul.bf16.vlgmr.msra.gmra.mxu1 %v3865_v10  ;;  %v2680_v63 = vld [vmem:[#allocation11 + $0x1f8] sm:$0xf0]  ;;  %v2695_v7 = vor.u32 %v3368_v61, %v2694_v60  ;;  %v3402_v61 = vld [vmem:[#allocation11 + $0x32c] sm:$0xf]  ;;  %v3436_v43 = vld [vmem:[#allocation13 + $0x34] sm:$0xf0] }
 0x16f   :  { %1423 = vmatmul.bf16.vlgmr.msrb.gmra.mxu0 %v3867_v15  ;;  %1433 = vmatpush.bf16.msrb.mxu1 %v2487_v2  ;;  %v2808_v2 = vld [vmem:[#allocation11 + $0x2f8] sm:$0xf0]  ;;  %v3334_v27 = vld [vmem:[#allocation11 + $0x10c] sm:$0xf]  ;;  %v3062_v44 = vld [vmem:[#allocation13 + $0xf0] sm:$0xf] }
 0x170   :  { %1475 = vmatpush.bf16.msra.mxu0 %v2871_v5  ;;  %v3322_v5 = vld [vmem:[#allocation11 + $0xac] sm:$0xf]  ;;  %v2744_v56 = vld [vmem:[#allocation11 + $0x278] sm:$0xf0] }
 0x171   :  { %1446 = vmatpush.bf16.msrb.mxu2 %v2631_v8  ;;  %v2683_v8 = vor.u32 %v3362_v62, %v2680_v63  ;;  %v2456_v59 = vld [vmem:[#allocation11 + $0x38] sm:$0xf0]  ;;  %v2747_v63 = vor.u32 %v3378_v55, %v2744_v56  ;;  %v3366_v29 = vld [vmem:[#allocation11 + $0x20c] sm:$0xf]  ;;  %v2942_v56 = vld [vmem:[#allocation13] sm:$0xf] }
 0x172   :  { %1460 = vmatpush.bf16.msrb.mxu3 %v2759_v12  ;;  %v2811_v12 = vor.u32 %v3394_v1, %v2808_v2  ;;  %v2840_v62 = vld [vmem:[#allocation11 + $0x338] sm:$0xf0]  ;;  %v2459_v2 = vor.u32 %v3306_v58, %v2456_v59  ;;  %v3038_v58 = vld [vmem:[#allocation13 + $0xc0] sm:$0xf] }
 0x173   :  { %1434 = vmatpush.bf16.msrb.mxu1 %v2471_v16  ;;  %v2523_v16 = vor.u32 %v3322_v5, %v2520_v6  ;;  %v2600_v1 = vld [vmem:[#allocation11 + $0x158] sm:$0xf0]  ;;  %v2843_v5 = vor.u32 %v3402_v61, %v2840_v62  ;;  %v3302_v6 = vld [vmem:[#allocation11 + $0xc] sm:$0xf]  ;;  %v3443_v61 = vld [vmem:[#allocation13 + $0x74] sm:$0xf] }
 0x174   :  { %1476 = vmatpush.bf16.msra.mxu0 %v2855_v19  ;;  %1395 = vmatmul.bf16.vlgmr.msra.gmra.mxu2 %v3871_v37  ;;  %v2907_v19 = vor.u32 %v3418_v9, %v2904_v11  ;;  %v2824_v11 = vld [vmem:[#allocation11 + $0x318] sm:$0xf0] }
 0x175   :  { %1409 = vmatmul.bf16.vlgmr.msra.gmra.mxu3 %v3873_v41  ;;  %1447 = vmatpush.bf16.msrb.mxu2 %v2615_v22  ;;  %v2667_v22 = vor.u32 %v3358_v13, %v2664_v14  ;;  %v3444_v13 = vld [vmem:[#allocation13 + $0x74] sm:$0xf0]  ;;  %v2696_v30 = vld [vmem:[#allocation11 + $0x218] sm:$0xf0] }
 0x176   :  { %1461 = vmatpush.bf16.msrb.mxu3 %v2743_v25  ;;  %v2795_v25 = vor.u32 %v3390_v17, %v2792_v18  ;;  %v2584_v17 = vld [vmem:[#allocation11 + $0x138] sm:$0xf0] }
 0x177   :  { %1435 = vmatpush.bf16.msrb.mxu1 %v2455_v28  ;;  %v2507_v28 = vor.u32 %v3318_v20, %v2504_v21  ;;  %v2712_v20 = vld [vmem:[#allocation11 + $0x238] sm:$0xf0] }
 0x178   :  { %1477 = vmatpush.bf16.msra.mxu0 %v2839_v32  ;;  %v3314_v32 = vld [vmem:[#allocation11 + $0x6c] sm:$0xf]  ;;  %v3000_v62 = vld [vmem:[#allocation13 + $0x78] sm:$0xf0] }
 0x179   :  { %1448 = vmatpush.bf16.msrb.mxu2 %v2599_v36  ;;  %v2872_v36 = vld [vmem:[#allocation11 + $0x378] sm:$0xf0] }
 0x17a   :  { %1462 = vmatpush.bf16.msrb.mxu3 %v2727_v42  ;;  %v2491_v42 = vor.u32 %v3314_v32, %v2488_v33  ;;  %v2875_v45 = vor.u32 %v3410_v35, %v2872_v36  ;;  %v2982_v33 = vld [vmem:[#allocation13 + $0x50] sm:$0xf]  ;;  %v2699_v35 = vor.u32 %v3366_v29, %v2696_v30  ;;  %v3006_v30 = vld [vmem:[#allocation13 + $0x80] sm:$0xf] }
 0x17b   :  { %1436 = vmatpush.bf16.msrb.mxu1 %v2439_v46  ;;  %v3310_v46 = vld [vmem:[#allocation11 + $0x4c] sm:$0xf] }
 0x17c   :  { %1478 = vmatpush.bf16.msra.mxu0 %v2823_v49  ;;  %v3406_v49 = vld [vmem:[#allocation11 + $0x34c] sm:$0xf]  ;;  %v2475_v54 = vor.u32 %v3310_v46, %v2472_v47  ;;  %v2958_v46 = vld [vmem:[#allocation13 + $0x20] sm:$0xf] }
 0x17d   :  { %1449 = vmatpush.bf16.msrb.mxu2 %v2583_v53  ;;  %v2616_v53 = vld [vmem:[#allocation11 + $0x178] sm:$0xf0] }
 0x17e   :  { %1463 = vmatpush.bf16.msrb.mxu3 %v2711_v57  ;;  %1437 = vmatmul.bf16.vlgmr.msrb.gmra.mxu1 %v3865_v10 }
 0x17f   :  { %1485 = vmatpush.bf16.msra.mxu1 %v2555_v50  ;;  %1479 = vmatmul.bf16.vlgmr.msra.gmra.mxu0 %v3867_v15  ;;  %v2856_v50 = vld [vmem:[#allocation11 + $0x358] sm:$0xf0] }
 0x180   :  { %1527 = vmatpush.bf16.msrb.mxu0 %v2939_v52  ;;  %v3346_v52 = vld [vmem:[#allocation11 + $0x16c] sm:$0xf]  ;;  %v2859_v57 = vor.u32 %v3406_v49, %v2856_v50  ;;  %v3458_v49 = vld [vmem:[#allocation13 + $0xe4] sm:$0xf0] }
 0x181   :  { %1450 = vmatpush.bf16.msrb.mxu2 %v2567_v4  ;;  %v2619_v60 = vor.u32 %v3346_v52, %v2616_v53  ;;  %v2728_v4 = vld [vmem:[#allocation11 + $0x258] sm:$0xf0]  ;;  %v3432_v52 = vld [vmem:[#allocation13 + $0x14] sm:$0xf0] }
 0x182   :  { %1464 = vmatpush.bf16.msrb.mxu3 %v2695_v7  ;;  %v2440_v7 = vld [vmem:[#allocation11 + $0x18] sm:$0xf0] }
 0x183   :  { %1486 = vmatpush.bf16.msra.mxu1 %v2539_v0  ;;  %v3342_v0 = vld [vmem:[#allocation11 + $0x14c] sm:$0xf]  ;;  %v2443_v18 = vor.u32 %v3302_v6, %v2440_v7  ;;  %v3441_v6 = vld [vmem:[#allocation13 + $0x64] sm:$0xf] }
 0x184   :  { %1528 = vmatpush.bf16.msrb.mxu0 %v2923_v3  ;;  %1451 = vmatmul.bf16.vlgmr.msrb.gmra.mxu2 %v3871_v37  ;;  %v3374_v3 = vld [vmem:[#allocation11 + $0x24c] sm:$0xf]  ;;  %v2603_v9 = vor.u32 %v3342_v0, %v2600_v1  ;;  %v3003_v0 = vor.u32 %v3443_v61, %v3000_v62  ;;  %v3030_v1 = vld [vmem:[#allocation13 + $0xb0] sm:$0xf] }
 0x185   :  { %1499 = vmatpush.bf16.msra.mxu2 %v2683_v8  ;;  %1465 = vmatmul.bf16.vlgmr.msrb.gmra.mxu3 %v3873_v41  ;;  %v3398_v8 = vld [vmem:[#allocation11 + $0x30c] sm:$0xf]  ;;  %v2731_v14 = vor.u32 %v3374_v3, %v2728_v4  ;;  %v3126_v3 = vld [vmem:[#allocation13 + $0x170] sm:$0xf] }
 0x186   :  { %1513 = vmatpush.bf16.msra.mxu3 %v2811_v12  ;;  %v2998_v12 = vld [vmem:[#allocation13 + $0x70] sm:$0xf]  ;;  %v2827_v21 = vor.u32 %v3398_v8, %v2824_v11  ;;  %v2992_v7 = vld [vmem:[#allocation13 + $0x68] sm:$0xf0]  ;;  %v3022_v11 = vld [vmem:[#allocation13 + $0xa0] sm:$0xf] }
 0x187   :  { %1487 = vmatpush.bf16.msra.mxu1 %v2523_v16  ;;  %v3338_v16 = vld [vmem:[#allocation11 + $0x12c] sm:$0xf] }
 0x188   :  { %1529 = vmatpush.bf16.msrb.mxu0 %v2907_v19  ;;  %v3370_v19 = vld [vmem:[#allocation11 + $0x22c] sm:$0xf]  ;;  %v2587_v23 = vor.u32 %v3338_v16, %v2584_v17  ;;  %v3474_v16 = vld [vmem:[#allocation13 + $0x164] sm:$0xf0]  ;;  %v3439_v17 = vld [vmem:[#allocation13 + $0x54] sm:$0xf] }
 0x189   :  { %1500 = vmatpush.bf16.msra.mxu2 %v2667_v22  ;;  %v2999_v22 = vor.u32 %v3444_v13, %v2998_v12  ;;  %v2715_v26 = vor.u32 %v3370_v19, %v2712_v20  ;;  %v3450_v12 = vld [vmem:[#allocation13 + $0xa4] sm:$0xf0]  ;;  %v3118_v13 = vld [vmem:[#allocation13 + $0x160] sm:$0xf] }
 0x18a   :  { %1514 = vmatpush.bf16.msra.mxu3 %v2795_v25  ;;  %v3442_v25 = vld [vmem:[#allocation13 + $0x64] sm:$0xf0]  ;;  %v3119_v19 = vor.u32 %v3474_v16, %v3118_v13 }
 0x18b   :  { %1488 = vmatpush.bf16.msra.mxu1 %v2507_v28  ;;  %v2568_v28 = vld [vmem:[#allocation11 + $0x118] sm:$0xf0]  ;;  %v3462_v13 = vld [vmem:[#allocation13 + $0x104] sm:$0xf0] }
 0x18c   :  { %1530 = vmatpush.bf16.msrb.mxu0 %v2891_v31  ;;  %v2991_v31 = vor.u32 %v3442_v25, %v2990_v24  ;;  %v2571_v32 = vor.u32 %v3334_v27, %v2568_v28  ;;  %v3472_v25 = vld [vmem:[#allocation13 + $0x154] sm:$0xf0]  ;;  %v2976_v27 = vld [vmem:[#allocation13 + $0x48] sm:$0xf0] }
 0x18d   :  { %1501 = vmatpush.bf16.msra.mxu2 %v2651_v34  ;;  %v3440_v34 = vld [vmem:[#allocation13 + $0x54] sm:$0xf0] }
 0x18e   :  { %1515 = vmatpush.bf16.msra.mxu3 %v2779_v38  ;;  %v2983_v36 = vor.u32 %v3440_v34, %v2982_v33  ;;  %v2974_v38 = vld [vmem:[#allocation13 + $0x40] sm:$0xf]  ;;  %v3470_v34 = vld [vmem:[#allocation13 + $0x144] sm:$0xf0] }
 0x18f   :  { %1489 = vmatpush.bf16.msra.mxu1 %v2491_v42  ;;  %v2975_v40 = vor.u32 %v3438_v39, %v2974_v38  ;;  %v2966_v42 = vld [vmem:[#allocation13 + $0x30] sm:$0xf] }
 0x190   :  { %1531 = vmatpush.bf16.msrb.mxu0 %v2875_v45  ;;  %v3460_v45 = vld [vmem:[#allocation13 + $0xf4] sm:$0xf0] }
 0x191   :  { %1502 = vmatpush.bf16.msra.mxu2 %v2635_v48  ;;  %v3063_v47 = vor.u32 %v3460_v45, %v3062_v44  ;;  %v3054_v48 = vld [vmem:[#allocation13 + $0xe0] sm:$0xf]  ;;  %v3468_v45 = vld [vmem:[#allocation13 + $0x134] sm:$0xf0] }
 0x192   :  { %1516 = vmatpush.bf16.msra.mxu3 %v2763_v51  ;;  %v3055_v51 = vor.u32 %v3458_v49, %v3054_v48  ;;  %v3457_v48 = vld [vmem:[#allocation13 + $0xe4] sm:$0xf] }
 0x193   :  { %1490 = vmatpush.bf16.msra.mxu1 %v2475_v54  ;;  %v3456_v54 = vld [vmem:[#allocation13 + $0xd4] sm:$0xf0] }
 0x194   :  { %1532 = vmatpush.bf16.msrb.mxu0 %v2859_v57  ;;  %v3430_v57 = vld [vmem:[#allocation13 + $0x4] sm:$0xf0] }
 0x195   :  { %1503 = vmatpush.bf16.msra.mxu2 %v2619_v60  ;;  %v2943_v59 = vor.u32 %v3430_v57, %v2942_v56  ;;  %v3454_v60 = vld [vmem:[#allocation13 + $0xc4] sm:$0xf0]  ;;  %v2952_v56 = vld [vmem:[#allocation13 + $0x18] sm:$0xf0]  ;;  %v3455_v57 = vld [vmem:[#allocation13 + $0xd4] sm:$0xf] }
 0x196   :  { %1517 = vmatpush.bf16.msra.mxu3 %v2747_v63  ;;  %v3039_v63 = vor.u32 %v3454_v60, %v3038_v58  ;;  %v3048_v60 = vld [vmem:[#allocation13 + $0xd8] sm:$0xf0] }
 0x197   :  { %1491 = vmatpush.bf16.msra.mxu1 %v2459_v2  ;;  %v3452_v2 = vld [vmem:[#allocation13 + $0xb4] sm:$0xf0]  ;;  %v3051_v62 = vor.u32 %v3455_v57, %v3048_v60  ;;  %v3486_v57 = vld [vmem:[#allocation13 + $0x1c4] sm:$0xf0]  ;;  %v3445_v60 = vld [vmem:[#allocation13 + $0x84] sm:$0xf] }
 0x198   :  { %1533 = vmatpush.bf16.msrb.mxu0 %v2843_v5  ;;  %v3031_v4 = vor.u32 %v3452_v2, %v3030_v1  ;;  %v3476_v5 = vld [vmem:[#allocation13 + $0x174] sm:$0xf0]  ;;  %v3429_v2 = vld [vmem:[#allocation13 + $0x4] sm:$0xf] }
 0x199   :  { %1504 = vmatpush.bf16.msra.mxu2 %v2603_v9  ;;  %v3127_v8 = vor.u32 %v3476_v5, %v3126_v3  ;;  %v2995_v9 = vor.u32 %v3441_v6, %v2992_v7  ;;  %v2944_v3 = vld [vmem:[#allocation13 + $0x8] sm:$0xf0] }
 0x19a   :  { %1518 = vmatpush.bf16.msra.mxu3 %v2731_v14  ;;  %v3023_v14 = vor.u32 %v3450_v12, %v3022_v11  ;;  %v2947_v6 = vor.u32 %v3429_v2, %v2944_v3  ;;  %v3040_v7 = vld [vmem:[#allocation13 + $0xc8] sm:$0xf0]  ;;  %v3070_v12 = vld [vmem:[#allocation13 + $0x100] sm:$0xf] }
 0x19b   :  { %1492 = vmatpush.bf16.msra.mxu1 %v2443_v18  ;;  %v2984_v18 = vld [vmem:[#allocation13 + $0x58] sm:$0xf0]  ;;  %v3104_v2 = vld [vmem:[#allocation13 + $0x148] sm:$0xf0] }
 0x19c   :  { %1534 = vmatpush.bf16.msrb.mxu0 %v2827_v21  ;;  %v2987_v20 = vor.u32 %v3439_v17, %v2984_v18  ;;  %v3014_v21 = vld [vmem:[#allocation13 + $0x90] sm:$0xf]  ;;  %v3071_v17 = vor.u32 %v3462_v13, %v3070_v12  ;;  %v3492_v18 = vld [vmem:[#allocation13 + $0x1f4] sm:$0xf0]  ;;  %v3467_v12 = vld [vmem:[#allocation13 + $0x134] sm:$0xf] }
 0x19d   :  { %1505 = vmatpush.bf16.msra.mxu2 %v2587_v23  ;;  %v3110_v23 = vld [vmem:[#allocation13 + $0x150] sm:$0xf]  ;;  %v3096_v13 = vld [vmem:[#allocation13 + $0x138] sm:$0xf0] }
 0x19e   :  { %1519 = vmatpush.bf16.msra.mxu3 %v2715_v26  ;;  %1493 = vmatmul.bf16.vlgmr.msra.gmra.mxu1 %v3865_v10  ;;  %v2967_v10 = vor.u32 %v3436_v43, %v2966_v42  ;;  %v3437_v26 = vld [vmem:[#allocation13 + $0x44] sm:$0xf]  ;;  %v3111_v28 = vor.u32 %v3472_v25, %v3110_v23  ;;  %v3459_v42 = vld [vmem:[#allocation13 + $0xf4] sm:$0xf]  ;;  %v3064_v43 = vld [vmem:[#allocation13 + $0xf8] sm:$0xf0] }
 0x19f   :  { %1955 = vmatpush.bf16.msrb.mxu1 %v2999_v22  ;;  %1535 = vmatmul.bf16.vlgmr.msrb.gmra.mxu0 %v3867_v15  ;;  %v3434_v15 = vld [vmem:[#allocation13 + $0x24] sm:$0xf0]  ;;  %v3448_v22 = vld [vmem:[#allocation13 + $0x94] sm:$0xf0]  ;;  %v2979_v29 = vor.u32 %v3437_v26, %v2976_v27  ;;  %v3067_v44 = vor.u32 %v3459_v42, %v3064_v43  ;;  %v3128_v25 = vld [vmem:[#allocation13 + $0x178] sm:$0xf0] }
 0x1a0   :  { %v2959_v50 = vor.u32 %v3434_v15, %v2958_v46  ;;  %v3015_v24 = vor.u32 %v3448_v22, %v3014_v21  ;;  %v3433_v15 = vld [vmem:[#allocation13 + $0x24] sm:$0xf] }
 0x1a1   :  { %1506 = vmatpush.bf16.msra.mxu2 %v2571_v32  ;;  %v3102_v32 = vld [vmem:[#allocation13 + $0x140] sm:$0xf] }
 0x1a2   :  { %1520 = vmatpush.bf16.msra.mxu3 %v2699_v35  ;;  %v3435_v35 = vld [vmem:[#allocation13 + $0x34] sm:$0xf]  ;;  %v3103_v39 = vor.u32 %v3470_v34, %v3102_v32  ;;  %v3024_v34 = vld [vmem:[#allocation13 + $0xa8] sm:$0xf0] }
 0x1a3   :  { %1956 = vmatpush.bf16.msrb.mxu1 %v2991_v31  ;;  %v3446_v31 = vld [vmem:[#allocation13 + $0x84] sm:$0xf0] }
 0x1a4   :  { %1507 = vmatmul.bf16.vlgmr.msra.gmra.mxu2 %v3871_v37  ;;  %v2950_v37 = vld [vmem:[#allocation13 + $0x10] sm:$0xf]  ;;  %v3007_v33 = vor.u32 %v3446_v31, %v3006_v30 }
 0x1a5   :  { %1521 = vmatmul.bf16.vlgmr.msra.gmra.mxu3 %v3873_v41  ;;  %1969 = vmatpush.bf16.msrb.mxu2 %v3063_v47  ;;  %v3046_v41 = vld [vmem:[#allocation13 + $0xd0] sm:$0xf]  ;;  %v2951_v53 = vor.u32 %v3432_v52, %v2950_v37  ;;  %v2960_v47 = vld [vmem:[#allocation13 + $0x28] sm:$0xf0] }
 0x1a6   :  { %v3047_v55 = vor.u32 %v3456_v54, %v3046_v41  ;;  %1983 = vmatpush.bf16.msrb.mxu3 %v3127_v8  ;;  %v2963_v49 = vor.u32 %v3433_v15, %v2960_v47  ;;  %v3892_v37 = vld [vmem:[%s3919_s6] sm:$0xf]  ;;  %v3086_v41 = vld [vmem:[#allocation13 + $0x120] sm:$0xf] }
 0x1a7   :  { %1957 = vmatpush.bf16.msrb.mxu1 %v2983_v36  ;;  %v2968_v36 = vld [vmem:[#allocation13 + $0x38] sm:$0xf0]  ;;  %v669_v61 = vperm.slane %v3892_v37, 0  ;;  %v3447_v47 = vld [vmem:[#allocation13 + $0x94] sm:$0xf] }
 0x1a9   :  { %1970 = vmatpush.bf16.msrb.mxu2 %v3055_v51 }
 0x1aa   :  { %1984 = vmatpush.bf16.msrb.mxu3 %v3119_v19  ;;  %v3451_v19 = vld [vmem:[#allocation13 + $0xb4] sm:$0xf] }
 0x1ab   :  { %1958 = vmatpush.bf16.msrb.mxu1 %v2975_v40  ;;  %v2971_v40 = vor.u32 %v3435_v35, %v2968_v36 }
 0x1ad   :  { %1971 = vmatpush.bf16.msrb.mxu2 %v3047_v55  ;;  %v3431_v55 = vld [vmem:[#allocation13 + $0x14] sm:$0xf] }
 0x1ae   :  { %1985 = vmatpush.bf16.msrb.mxu3 %v3111_v28  ;;  %v3182_v28 = vld [vmem:[#allocation13 + $0x1e0] sm:$0xf] }
 0x1af   :  { %1959 = vmatpush.bf16.msrb.mxu1 %v2967_v10  ;;  %v3094_v10 = vld [vmem:[#allocation13 + $0x130] sm:$0xf] }
 0x1b0   :  { %v3095_v46 = vor.u32 %v3468_v45, %v3094_v10  ;;  %v3488_v10 = vld [vmem:[#allocation13 + $0x1d4] sm:$0xf0] }
 0x1b1   :  { %1972 = vmatpush.bf16.msrb.mxu2 %v3039_v63  ;;  %v3078_v63 = vld [vmem:[#allocation13 + $0x110] sm:$0xf] }
 0x1b2   :  { %1986 = vmatpush.bf16.msrb.mxu3 %v3103_v39  ;;  %v3120_v39 = vld [vmem:[#allocation13 + $0x168] sm:$0xf0] }
 0x1b3   :  { %1960 = vmatpush.bf16.msrb.mxu1 %v2959_v50  ;;  %v3056_v50 = vld [vmem:[#allocation13 + $0xe8] sm:$0xf0] }
 0x1b4   :  { %v3059_v51 = vor.u32 %v3457_v48, %v3056_v50  ;;  %v3016_v48 = vld [vmem:[#allocation13 + $0x98] sm:$0xf0] }
 0x1b5   :  { %1973 = vmatpush.bf16.msrb.mxu2 %v3031_v4  ;;  %v3453_v4 = vld [vmem:[#allocation13 + $0xc4] sm:$0xf]  ;;  %v3019_v50 = vor.u32 %v3447_v47, %v3016_v48  ;;  %v3491_v48 = vld [vmem:[#allocation13 + $0x1f4] sm:$0xf] }
 0x1b6   :  { %1987 = vmatpush.bf16.msrb.mxu3 %v3095_v46  ;;  %v3043_v11 = vor.u32 %v3453_v4, %v3040_v7  ;;  %v3158_v7 = vld [vmem:[#allocation13 + $0x1b0] sm:$0xf] }
 0x1b7   :  { %1961 = vmatpush.bf16.msrb.mxu1 %v2951_v53  ;;  %v3466_v53 = vld [vmem:[#allocation13 + $0x124] sm:$0xf0] }
 0x1b8   :  { %v3087_v54 = vor.u32 %v3466_v53, %v3086_v41  ;;  %v670_v41 = vperm.slane %v3892_v37, 1 }
 0x1b9   :  { %1974 = vmatpush.bf16.msrb.mxu2 %v3023_v14  ;;  %v3190_v14 = vld [vmem:[#allocation13 + $0x1f0] sm:$0xf] }
 0x1ba   :  { %1988 = vmatpush.bf16.msrb.mxu3 %v3087_v54  ;;  %v3191_v22 = vor.u32 %v3492_v18, %v3190_v14  ;;  %v3150_v14 = vld [vmem:[#allocation13 + $0x1a0] sm:$0xf] }
 0x1bb   :  { %1962 = vmatpush.bf16.msrb.mxu1 %v2943_v59  ;;  %v2955_v59 = vor.u32 %v3431_v55, %v2952_v56  ;;  %v3166_v56 = vld [vmem:[#allocation13 + $0x1c0] sm:$0xf] }
 0x1bc   :  { %1997 = vmatpush.bf16.msra.mxu0 %v3191_v22  ;;  %v3088_v22 = vld [vmem:[#allocation13 + $0x128] sm:$0xf0] }
 0x1bd   :  { %1975 = vmatpush.bf16.msrb.mxu2 %v3015_v24  ;;  %v3475_v24 = vld [vmem:[#allocation13 + $0x174] sm:$0xf] }
 0x1be   :  { %v3131_v26 = vor.u32 %v3475_v24, %v3128_v25 }
 0x1bf   :  { %2011 = vmatpush.bf16.msra.mxu1 %v3003_v0  ;;  %v3464_v0 = vld [vmem:[#allocation13 + $0x114] sm:$0xf0] }
 0x1c0   :  { %v3079_v1 = vor.u32 %v3464_v0, %v3078_v63 }
 0x1c1   :  { %1976 = vmatpush.bf16.msrb.mxu2 %v3007_v33  ;;  %v3449_v33 = vld [vmem:[#allocation13 + $0xa4] sm:$0xf] }
 0x1c2   :  { %1989 = vmatpush.bf16.msrb.mxu3 %v3079_v1  ;;  %v3027_v36 = vor.u32 %v3449_v33, %v3024_v34  ;;  %v3469_v1 = vld [vmem:[#allocation13 + $0x144] sm:$0xf]  ;;  %v3463_v34 = vld [vmem:[#allocation13 + $0x114] sm:$0xf] }
 0x1c3   :  { %2012 = vmatpush.bf16.msra.mxu1 %v2995_v9 }
 0x1c5   :  { %2025 = vmatpush.bf16.msra.mxu2 %v3067_v44  ;;  %v3174_v44 = vld [vmem:[#allocation13 + $0x1d0] sm:$0xf] }
 0x1c6   :  { %1990 = vmatpush.bf16.msrb.mxu3 %v3071_v17  ;;  %v3175_v15 = vor.u32 %v3488_v10, %v3174_v44  ;;  %v3482_v17 = vld [vmem:[#allocation13 + $0x1a4] sm:$0xf0] }
 0x1c7   :  { %2013 = vmatpush.bf16.msra.mxu1 %v2987_v20  ;;  %v3032_v20 = vld [vmem:[#allocation13 + $0xb8] sm:$0xf0]  ;;  %v3151_v18 = vor.u32 %v3482_v17, %v3150_v14 }
 0x1c8   :  { %v3035_v23 = vor.u32 %v3451_v19, %v3032_v20  ;;  %v3160_v14 = vld [vmem:[#allocation13 + $0x1b8] sm:$0xf0] }
 0x1c9   :  { %2026 = vmatpush.bf16.msra.mxu2 %v3059_v51  ;;  %v3112_v51 = vld [vmem:[#allocation13 + $0x158] sm:$0xf0] }
 0x1ca   :  { %2039 = vmatpush.bf16.msra.mxu3 %v3131_v26 }
 0x1cb   :  { %2014 = vmatpush.bf16.msra.mxu1 %v2979_v29  ;;  %v3490_v29 = vld [vmem:[#allocation13 + $0x1e4] sm:$0xf0] }
 0x1cc   :  { %v3183_v32 = vor.u32 %v3490_v29, %v3182_v28  ;;  %v3142_v29 = vld [vmem:[#allocation13 + $0x190] sm:$0xf] }
 0x1cd   :  { %2027 = vmatpush.bf16.msra.mxu2 %v3051_v62 }
 0x1ce   :  { %1998 = vmatpush.bf16.msra.mxu0 %v3183_v32 }
 0x1cf   :  { %2015 = vmatpush.bf16.msra.mxu1 %v2971_v40 }
 0x1d1   :  { %2028 = vmatpush.bf16.msra.mxu2 %v3043_v11 }
 0x1d2   :  { %1999 = vmatpush.bf16.msra.mxu0 %v3175_v15 }
 0x1d3   :  { %2016 = vmatpush.bf16.msra.mxu1 %v2963_v49  ;;  %v3471_v49 = vld [vmem:[#allocation13 + $0x154] sm:$0xf] }
 0x1d4   :  { %v3115_v54 = vor.u32 %v3471_v49, %v3112_v51  ;;  %v3192_v49 = vld [vmem:[#allocation13 + $0x1f8] sm:$0xf0] }
 0x1d5   :  { %2029 = vmatpush.bf16.msra.mxu2 %v3035_v23 }
 0x1d7   :  { %2017 = vmatpush.bf16.msra.mxu1 %v2955_v59 }
 0x1d9   :  { %2030 = vmatpush.bf16.msra.mxu2 %v3027_v36 }
 0x1db   :  { %v1326_v38 = vpop.f32.mrf.mxu1  ;;  %2018 = vmatpush.bf16.msra.mxu1 %v2947_v6  ;;  %v3107_v6 = vor.u32 %v3469_v1, %v3104_v2 }
 0x1dc   :  { %v3894_v52 = vpop.f32.mrf.mxu0  ;;  %v1327_v8 = vadd.f32 %v1326_v38, %v669_v61  ;;  %v3473_v38 = vld [vmem:[#allocation13 + $0x164] sm:$0xf] }
 0x1dd   :  { %v3123_v43 = vor.u32 %v3473_v38, %v3120_v39  ;;  %2031 = vmatpush.bf16.msra.mxu2 %v3019_v50  ;;  %v671_v38 = vperm.slane %v3892_v37, 2 }
 0x1df   :  { %2040 = vmatpush.bf16.msra.mxu3 %v3123_v43 }
 0x1e3   :  { %v1328_v58 = vpop.f32.mrf.mxu1  ;;  %2041 = vmatpush.bf16.msra.mxu3 %v3115_v54 }
 0x1e4   :  { %v1370_v21 = vpop.f32.mrf.mxu0  ;;  %v1329_v30 = vadd.f32 %v1328_v58, %v669_v61  ;;  %v3008_v61 = vld [vmem:[#allocation13 + $0x88] sm:$0xf0] }
 0x1e5   :  { %v3011_v0 = vor.u32 %v3445_v60, %v3008_v61  ;;  %v3487_v61 = vld [vmem:[#allocation13 + $0x1d4] sm:$0xf] }
 0x1e7   :  { %v1340_v5 = vpop.f32.mrf.mxu2  ;;  %2032 = vmatpush.bf16.msra.mxu2 %v3011_v0  ;;  %2042 = vmatpush.bf16.msra.mxu3 %v3107_v6  ;;  %v3485_v6 = vld [vmem:[#allocation13 + $0x1c4] sm:$0xf] }
 0x1e8   :  { %v1354_v9 = vpop.f32.mrf.mxu3  ;;  %v1341_v16 = vadd.f32 %v1340_v5, %v1327_v8  ;;  %v3484_v8 = vld [vmem:[#allocation13 + $0x1b4] sm:$0xf0] }
 0x1e9   :  { %v3159_v11 = vor.u32 %v3484_v8, %v3158_v7  ;;  %v3168_v7 = vld [vmem:[#allocation13 + $0x1c8] sm:$0xf0] }
 0x1ea   :  { %v1355_v31 = vadd.f32 %v1354_v9, %v1341_v16  ;;  %v3099_v16 = vor.u32 %v3467_v12, %v3096_v13  ;;  %v3171_v8 = vor.u32 %v3485_v6, %v3168_v7  ;;  %v3483_v13 = vld [vmem:[#allocation13 + $0x1b4] sm:$0xf] }
 0x1eb   :  { %v1382_v27 = vpop.f32.mrf.mxu1 }
 0x1ec   :  { %v1369_v45 = vadd.f32 %v3894_v52, %v1355_v31  ;;  %v1424_v55 = vpop.f32.mrf.mxu0  ;;  %v3167_v52 = vor.u32 %v3486_v57, %v3166_v56  ;;  %v1383_v3 = vadd.f32 %v1382_v27, %v670_v41  ;;  %2043 = vmatpush.bf16.msra.mxu3 %v3099_v16  ;;  %v3489_v56 = vld [vmem:[#allocation13 + $0x1e4] sm:$0xf]  ;;  %v3184_v57 = vld [vmem:[#allocation13 + $0x1e8] sm:$0xf0]  ;;  %v3163_v16 = vor.u32 %v3483_v13, %v3160_v14 }
 0x1ee   :  { %v1553_v58 = vmax.f32 %v1369_v45, 0.0  ;;  %2000 = vmatpush.bf16.msra.mxu0 %v3167_v52  ;;  %v3461_v45 = vld [vmem:[#allocation13 + $0x104] sm:$0xf] }
 0x1ef   :  { %v1342_v35 = vpop.f32.mrf.mxu2 }
 0x1f0   :  { %v1343_v40 = vadd.f32 %v1342_v35, %v1329_v30  ;;  %v1356_v42 = vpop.f32.mrf.mxu3  ;;  %v3480_v30 = vld [vmem:[#allocation13 + $0x194] sm:$0xf0]  ;;  %v3080_v35 = vld [vmem:[#allocation13 + $0x118] sm:$0xf0] }
 0x1f1   :  { %v3143_v33 = vor.u32 %v3480_v30, %v3142_v29  ;;  %v3083_v36 = vor.u32 %v3463_v34, %v3080_v35 }
 0x1f2   :  { %v1357_v46 = vadd.f32 %v1356_v42, %v1343_v40  ;;  %2001 = vmatpush.bf16.msra.mxu0 %v3159_v11  ;;  %v3134_v40 = vld [vmem:[#allocation13 + $0x180] sm:$0xf]  ;;  %v3478_v42 = vld [vmem:[#allocation13 + $0x184] sm:$0xf0] }
 0x1f3   :  { %v1384_v62 = vpop.f32.mrf.mxu1  ;;  %v3135_v10 = vor.u32 %v3478_v42, %v3134_v40 }
 0x1f4   :  { %v1371_v53 = vadd.f32 %v1370_v21, %v1357_v46  ;;  %v1385_v19 = vadd.f32 %v1384_v62, %v670_v41  ;;  %v3465_v21 = vld [vmem:[#allocation13 + $0x124] sm:$0xf]  ;;  %v1426_v23 = vpop.f32.mrf.mxu0  ;;  %v3072_v46 = vld [vmem:[#allocation13 + $0x108] sm:$0xf0]  ;;  %v3176_v62 = vld [vmem:[#allocation13 + $0x1d8] sm:$0xf0] }
 0x1f5   :  { %v3091_v25 = vor.u32 %v3465_v21, %v3088_v22  ;;  %v3075_v47 = vor.u32 %v3461_v45, %v3072_v46  ;;  %v3179_v0 = vor.u32 %v3487_v61, %v3176_v62  ;;  %v3479_v21 = vld [vmem:[#allocation13 + $0x194] sm:$0xf]  ;;  %v3144_v22 = vld [vmem:[#allocation13 + $0x198] sm:$0xf0]  ;;  %v3502_v62 = vld [vmem:[#allocation14 + $0x48] sm:$0xff] }
 0x1f6   :  { %v1557_v59 = vmax.f32 %v1371_v53, 0.0  ;;  %2002 = vmatpush.bf16.msra.mxu0 %v3151_v18  ;;  %v3195_v53 = vor.u32 %v3491_v48, %v3192_v49  ;;  %v3481_v18 = vld [vmem:[#allocation13 + $0x1a4] sm:$0xf]  ;;  %v3498_v48 = vld [vmem:[#allocation14 + $0x28] sm:$0xff] }
 0x1f7   :  { %v1396_v63 = vpop.f32.mrf.mxu2  ;;  %2044 = vmatpush.bf16.msra.mxu3 %v3091_v25  ;;  %v3477_v25 = vld [vmem:[#allocation13 + $0x184] sm:$0xf] }
 0x1f8   :  { %v1561_v4 = vpack.c.bf16 %v1557_v59, %v1553_v58  ;;  %v1410_v5 = vpop.f32.mrf.mxu3  ;;  %v1397_v9 = vadd.f32 %v1396_v63, %v1383_v3  ;;  %v3187_v59 = vor.u32 %v3489_v56, %v3184_v57  ;;  %v3497_v49 = vld [vmem:[#allocation14 + $0x20] sm:$0xff] }
 0x1f9   :  { %v3493_v56 = vld [vmem:[#allocation14] sm:$0xff] }
 0x1fa   :  { %1963 = vmatmul.bf16.vlgmr.msrb.gmra.mxu1 %v1561_v4  ;;  %v1411_v20 = vadd.f32 %v1410_v5, %v1397_v9  ;;  %2003 = vmatpush.bf16.msra.mxu0 %v3143_v33  ;;  %v3505_v57 = vld [vmem:[#allocation14 + $0x60] sm:$0xff] }
 0x1fb   :  { %v1438_v28 = vpop.f32.mrf.mxu1  ;;  %2045 = vmatpush.bf16.msra.mxu3 %v3083_v36 }
 0x1fc   :  { %v1425_v31 = vadd.f32 %v1424_v55, %v1411_v20  ;;  %v1439_v50 = vadd.f32 %v1438_v28, %v671_v38  ;;  %v1480_v54 = vpop.f32.mrf.mxu0 }
 0x1fe   :  { %v1554_v43 = vmax.f32 %v1425_v31, 0.0  ;;  %2004 = vmatpush.bf16.msra.mxu0 %v3135_v10 }
 0x1ff   :  { %v1398_v24 = vpop.f32.mrf.mxu2  ;;  %2046 = vmatpush.bf16.msra.mxu3 %v3075_v47  ;;  %v3499_v47 = vld [vmem:[#allocation14 + $0x30] sm:$0xff] }
 0x200   :  { %v1399_v26 = vadd.f32 %v1398_v24, %v1385_v19  ;;  %v1412_v27 = vpop.f32.mrf.mxu3  ;;  %v3152_v19 = vld [vmem:[#allocation13 + $0x1a8] sm:$0xf0]  ;;  %v3147_v24 = vor.u32 %v3479_v21, %v3144_v22 }
 0x201   :  { %v3155_v20 = vor.u32 %v3481_v18, %v3152_v19 }
 0x202   :  { %v1413_v32 = vadd.f32 %v1412_v27, %v1399_v26  ;;  %2053 = vmatpush.bf16.msrb.mxu0 %v3195_v53  ;;  %v3136_v26 = vld [vmem:[#allocation13 + $0x188] sm:$0xf0]  ;;  %v672_v27 = vperm.slane %v3892_v37, 3  ;;  %v3507_v53 = vld [vmem:[#allocation14 + $0x70] sm:$0xff] }
 0x203   :  { %v1440_v58 = vpop.f32.mrf.mxu1  ;;  %v3139_v28 = vor.u32 %v3477_v25, %v3136_v26 }
 0x204   :  { %v1427_v39 = vadd.f32 %v1426_v23, %v1413_v32  ;;  %v1441_v52 = vadd.f32 %v1440_v58, %v671_v38  ;;  %v3504_v58 = vld [vmem:[#allocation14 + $0x58] sm:$0xff] }
 0x206   :  { %v1558_v44 = vmax.f32 %v1427_v39, 0.0  ;;  %2054 = vmatpush.bf16.msrb.mxu0 %v3187_v59 }
 0x207   :  { %v1452_v15 = vpop.f32.mrf.mxu2 }
 0x208   :  { %v1562_v51 = vpack.c.bf16 %v1558_v44, %v1554_v43  ;;  %v1466_v41 = vpop.f32.mrf.mxu3  ;;  %v1453_v55 = vadd.f32 %v1452_v15, %v1439_v50  ;;  %v3500_v15 = vld [vmem:[#allocation14 + $0x38] sm:$0xff] }
 0x209   :  { %2211 = vmatpush.bf16.msrb.mxu1 %v3500_v15  ;;  %v3496_v50 = vld [vmem:[#allocation14 + $0x18] sm:$0xff] }
 0x20a   :  { %1977 = vmatmul.bf16.vlgmr.msrb.gmra.mxu2 %v1562_v51  ;;  %2019 = vmatmul.bf16.vlgmr.msra.gmra.mxu1 %v1561_v4  ;;  %v1467_v60 = vadd.f32 %v1466_v41, %v1453_v55  ;;  %v1482_v4 = vpop.f32.mrf.mxu0  ;;  %v3495_v41 = vld [vmem:[#allocation14 + $0x10] sm:$0xff]  ;;  %v3506_v55 = vld [vmem:[#allocation14 + $0x68] sm:$0xff] }
 0x20b   :  { %2055 = vmatpush.bf16.msrb.mxu0 %v3179_v0  ;;  %v3501_v0 = vld [vmem:[#allocation14 + $0x40] sm:$0xff] }
 0x20c   :  { %v1481_v3 = vadd.f32 %v1480_v54, %v1467_v60  ;;  %v3494_v54 = vld [vmem:[#allocation14 + $0x8] sm:$0xff] }
 0x20d   :  { %2212 = vmatpush.bf16.msrb.mxu1 %v3499_v47 }
 0x20e   :  { %v1555_v11 = vmax.f32 %v1481_v3, 0.0 }
 0x20f   :  { %v1454_v63 = vpop.f32.mrf.mxu2  ;;  %2056 = vmatpush.bf16.msrb.mxu0 %v3171_v8 }
 0x210   :  { %v1455_v1 = vadd.f32 %v1454_v63, %v1441_v52  ;;  %v1468_v2 = vpop.f32.mrf.mxu3  ;;  %v3503_v52 = vld [vmem:[#allocation14 + $0x50] sm:$0xff] }
 0x211   :  { %2213 = vmatpush.bf16.msrb.mxu1 %v3498_v48  ;;  %v1629_v63 = vld [vmem:[%s3921_s8] sm:$0x3] }
 0x212   :  { %v1469_v5 = vadd.f32 %v1468_v2, %v1455_v1  ;;  %v1631_v2 = vperm.slane %v1629_v63, 0  ;;  %v1632_v22 = vperm.slane %v1629_v63, 1 }
 0x213   :  { %2057 = vmatpush.bf16.msrb.mxu0 %v3163_v16 }
 0x214   :  { %v1483_v9 = vadd.f32 %v1482_v4, %v1469_v5 }
 0x215   :  { %2214 = vmatpush.bf16.msrb.mxu1 %v3497_v49 }
 0x216   :  { %v1559_v12 = vmax.f32 %v1483_v9, 0.0 }
 0x217   :  { %2058 = vmatpush.bf16.msrb.mxu0 %v3155_v20 }
 0x218   :  { %v1563_v17 = vpack.c.bf16 %v1559_v12, %v1555_v11 }
 0x219   :  { %2215 = vmatpush.bf16.msrb.mxu1 %v3496_v50 }
 0x21a   :  { %1991 = vmatmul.bf16.vlgmr.msrb.gmra.mxu3 %v1563_v17  ;;  %2033 = vmatmul.bf16.vlgmr.msra.gmra.mxu2 %v1562_v51  ;;  %v3508_v51 = vld [vmem:[#allocation14 + $0x78] sm:$0xff] }
 0x21b   :  { %v1494_v23 = vpop.f32.mrf.mxu1  ;;  %2059 = vmatpush.bf16.msrb.mxu0 %v3147_v24  ;;  %2225 = vmatpush.bf16.msrb.mxu2 %v3508_v51 }
 0x21c   :  { %v1495_v30 = vadd.f32 %v1494_v23, %v672_v27  ;;  %v1536_v32 = vpop.f32.mrf.mxu0 }
 0x21d   :  { %2216 = vmatpush.bf16.msrb.mxu1 %v3495_v41 }
 0x21f   :  { %2060 = vmatpush.bf16.msrb.mxu0 %v3139_v28  ;;  %2226 = vmatpush.bf16.msrb.mxu2 %v3507_v53 }
 0x221   :  { %2217 = vmatpush.bf16.msrb.mxu1 %v3494_v54 }
 0x223   :  { %v1496_v34 = vpop.f32.mrf.mxu1  ;;  %2227 = vmatpush.bf16.msrb.mxu2 %v3506_v55 }
 0x224   :  { %v1497_v35 = vadd.f32 %v1496_v34, %v672_v27  ;;  %v1538_v44 = vpop.f32.mrf.mxu0 }
 0x225   :  { %2218 = vmatpush.bf16.msrb.mxu1 %v3493_v56 }
 0x227   :  { %v1508_v29 = vpop.f32.mrf.mxu2  ;;  %2228 = vmatpush.bf16.msrb.mxu2 %v3505_v57 }
 0x228   :  { %v1522_v31 = vpop.f32.mrf.mxu3  ;;  %v1509_v33 = vadd.f32 %v1508_v29, %v1495_v30 }
 0x22a   :  { %2047 = vmatmul.bf16.vlgmr.msra.gmra.mxu3 %v1563_v17  ;;  %v1523_v36 = vadd.f32 %v1522_v31, %v1509_v33 }
 0x22b   :  { %2229 = vmatpush.bf16.msrb.mxu2 %v3504_v58 }
 0x22c   :  { %v1537_v42 = vadd.f32 %v1536_v32, %v1523_v36 }
 0x22e   :  { %v1556_v37 = vmax.f32 %v1537_v42, 0.0 }
 0x22f   :  { %v1510_v38 = vpop.f32.mrf.mxu2  ;;  %2230 = vmatpush.bf16.msrb.mxu2 %v3503_v52 }
 0x230   :  { %v1511_v39 = vadd.f32 %v1510_v38, %v1497_v35  ;;  %v1524_v40 = vpop.f32.mrf.mxu3 }
 0x232   :  { %v1525_v43 = vadd.f32 %v1524_v40, %v1511_v39 }
 0x233   :  { %2231 = vmatpush.bf16.msrb.mxu2 %v3502_v62 }
 0x234   :  { %v1539_v10 = vadd.f32 %v1538_v44, %v1525_v43  ;;  %v3525_v43 = vld [vmem:[%s3923_s10] ss:$0 sm:$0xff] }
 0x236   :  { %v1560_v45 = vmax.f32 %v1539_v10, 0.0 }
 0x237   :  { %2232 = vmatpush.bf16.msrb.mxu2 %v3501_v0 }
 0x238   :  { %v1564_v46 = vpack.c.bf16 %v1560_v45, %v1556_v37 }
 0x23a   :  { %2005 = vmatmul.bf16.vlgmr.msra.gmra.mxu0 %v1564_v46 }
 0x24a   :  { %2061 = vmatmul.bf16.vlgmr.msrb.gmra.mxu0 %v1564_v46 }
 0x277   :  { %v1964_v59 = vpop.f32.mrf.mxu1 }
 0x278   :  { %v1965_v7 = vadd.f32 %v1964_v59, %v1631_v2 }
 0x27f   :  { %v1966_v1 = vpop.f32.mrf.mxu1 }
 0x280   :  { %v1967_v4 = vadd.f32 %v1966_v1, %v1631_v2 }
 0x287   :  { %v2020_v12 = vpop.f32.mrf.mxu1 }
 0x288   :  { %v2021_v26 = vadd.f32 %v2020_v12, %v1632_v22 }
 0x28d   :  { %v1978_v60 = vpop.f32.mrf.mxu2 }
 0x28e   :  { %v1979_v8 = vadd.f32 %v1978_v60, %v1965_v7 }
 0x28f   :  { %v2022_v24 = vpop.f32.mrf.mxu1 }
 0x290   :  { %v2023_v28 = vadd.f32 %v2022_v24, %v1632_v22 }
 0x295   :  { %v1980_v3 = vpop.f32.mrf.mxu2 }
 0x296   :  { %v1981_v9 = vadd.f32 %v1980_v3, %v1967_v4 }
 0x29d   :  { %v1992_v61 = vpop.f32.mrf.mxu3  ;;  %v2034_v16 = vpop.f32.mrf.mxu2 }
 0x29e   :  { %v1993_v11 = vadd.f32 %v1992_v61, %v1979_v8  ;;  %v2035_v29 = vadd.f32 %v2034_v16, %v2021_v26 }
 0x2a5   :  { %v1994_v5 = vpop.f32.mrf.mxu3  ;;  %v2036_v27 = vpop.f32.mrf.mxu2 }
 0x2a6   :  { %v1995_v13 = vadd.f32 %v1994_v5, %v1981_v9  ;;  %v2037_v31 = vadd.f32 %v2036_v27, %v2023_v28 }
 0x2ad   :  { %v2048_v19 = vpop.f32.mrf.mxu3 }
 0x2ae   :  { %v2049_v32 = vadd.f32 %v2048_v19, %v2035_v29 }
 0x2b5   :  { %v2050_v30 = vpop.f32.mrf.mxu3 }
 0x2b6   :  { %v2051_v33 = vadd.f32 %v2050_v30, %v2037_v31 }
 0x2b7   :  { %v2006_v6 = vpop.f32.mrf.mxu0 }
 0x2b8   :  { %v2007_v14 = vadd.f32 %v2006_v6, %v1993_v11 }
 0x2ba   :  { %v2073_v20 = vmax.f32 %v2007_v14, 0.0 }
 0x2bf   :  { %v2008_v17 = vpop.f32.mrf.mxu0 }
 0x2c0   :  { %v2009_v18 = vadd.f32 %v2008_v17, %v1995_v13 }
 0x2c2   :  { %v2075_v21 = vmax.f32 %v2009_v18, 0.0 }
 0x2c4   :  { %v2077_v23 = vpack.c.bf16 %v2075_v21, %v2073_v20 }
 0x2c6   :  { %2219 = vmatmul.bf16.vlgmr.msrb.gmra.mxu1 %v2077_v23 }
 0x2c7   :  { %v2062_v25 = vpop.f32.mrf.mxu0 }
 0x2c8   :  { %v2063_v34 = vadd.f32 %v2062_v25, %v2049_v32 }
 0x2ca   :  { %v2074_v38 = vmax.f32 %v2063_v34, 0.0 }
 0x2cf   :  { %v2064_v35 = vpop.f32.mrf.mxu0 }
 0x2d0   :  { %v2065_v36 = vadd.f32 %v2064_v35, %v2051_v33 }
 0x2d2   :  { %v2076_v39 = vmax.f32 %v2065_v36, 0.0 }
 0x2d4   :  { %v2078_v40 = vpack.c.bf16 %v2076_v39, %v2074_v38 }
 0x2d6   :  { %2233 = vmatmul.bf16.vlgmr.msrb.gmra.mxu2 %v2078_v40 }
 0x343   :  { %v2220_v42 = vpop.f32.mrf.mxu1 }
 0x344   :  { %v2221_v44 = vadd.f32 %v3525_v43, %v2220_v42 }
 0x34b   :  { %v2222_v45 = vpop.f32.mrf.mxu1 }
 0x34c   :  { %v2223_v46 = vadd.f32 %v3525_v43, %v2222_v45 }
 0x359   :  { %v2234_v10 = vpop.f32.mrf.mxu2 }
 0x35a   :  { %v2235_v37 = vadd.f32 %v2234_v10, %v2221_v44 }
 0x35c   :  { %2239 = vst [vmem:[#allocation16] sm:$0xff] %v2235_v37 }
 0x361   :  { %v2236_v15 = vpop.f32.mrf.mxu2 }
 0x362   :  { %v2237_v47 = vadd.f32 %v2236_v15, %v2223_v46 }
 0x364   :  { %2240 = vst [vmem:[#allocation16 + $0x8] sm:$0xff] %v2237_v47 }
 0x365   :  { %2253 = dma.vmem_to_hbm [thread:$0]  %s2246_s20, 256, %s2248_s5, [#allocation4], %s3765_s15, %s3765_s15, %s3766_s16  }
 0x366   :  { %3752 = dma.done.wait [#allocation4], 256  }
 0x367   :  { %3753 = vsyncadd [#allocation4], 4294967040 }
 0x368   :  { %2258 = vsyncpa [#allocation3], 1 }
 0x369   :  { %2259 = vsyncpa [#allocation6], 1 }
 0x36a   :  { %2260 = vsyncpa [#allocation9], 1 }
 0x36b   :  { %2261 = vsyncpa [#allocation12], 1 }
 0x36c   :  { %2262 = vsyncpa [#allocation15], 1 }
 0x36d   :  { %2263 = vsyncpa [#allocation4], 1 }

</bundles_post_ra>
